<compile_context>
chip_gen: v7x
topology: tpu7x:2x2x1
jax: 0.10.0
libtpu: 0.0.40
codegen_flags: <defaults>
</compile_context>

<pallas_src>
import functools

import jax
import jax.numpy as jnp
from jax.experimental import pallas as pl
from jax.experimental.pallas import tpu as pltpu


# ---------------------------------------------------------------------------
# Pallas kernels (one grid step == one sample, channel-major layout)
# ---------------------------------------------------------------------------
def _convt_gn_lrelu_kernel(x_ref, w_ref, b_ref, a_ref, g_ref, be_ref, o_ref, *,
                           wp, wo, mw, denom, eps, slope):
    """Fused conv-transpose (as 3x3 correlation) + bias + GroupNorm + LeakyReLU.

    x_ref : (Cin, Sp)      padded/dilated activation, spatial flattened (bf16)
    w_ref : (Cout, 9*Cin)  transposed forward-conv weight matrix (bf16)
    b_ref : (Cout, 1)      conv bias (f32)
    a_ref : (Cout, Cout)   group indicator (1 iff same GroupNorm group) (f32)
    g_ref : (Cout, 1)      GroupNorm gamma (f32)
    be_ref: (Cout, 1)      GroupNorm beta  (f32)
    o_ref : (Cout, Mw)     wide output (Mw = Ho*Wp), lane-dense store
    """
    # Transposed im2col, built in-register: tap (ky,kx) is a contiguous slice
    # of the flattened spatial axis starting at ky*Wp + kx.
    taps = [x_ref[:, ky * wp + kx: ky * wp + kx + mw]
            for ky in range(3) for kx in range(3)]
    p = jnp.concatenate(taps, axis=0)                        # (9*Cin, Mw) bf16

    y = jnp.dot(w_ref[...], p, preferred_element_type=jnp.float32)  # (Cout, Mw)
    y = y + b_ref[...]

    # Mask the Wp-Wo junk columns of the wide output out of the statistics.
    col = jax.lax.broadcasted_iota(jnp.int32, (1, mw), 1)
    valid = (col % wp) < wo                                  # (1, Mw)

    # GroupNorm (f32, centered two-pass variance to match PyTorch numerics).
    s1 = jnp.sum(jnp.where(valid, y, 0.0), axis=1, keepdims=True)    # (Cout, 1)
    mean = jnp.dot(a_ref[...], s1,
                   preferred_element_type=jnp.float32) / denom       # (Cout, 1)
    d = jnp.where(valid, y - mean, 0.0)
    s2 = jnp.sum(d * d, axis=1, keepdims=True)
    var = jnp.dot(a_ref[...], s2,
                  preferred_element_type=jnp.float32) / denom
    rstd = jax.lax.rsqrt(var + eps)

    yn = (y - mean) * (rstd * g_ref[...]) + be_ref[...]
    o_ref[...] = jnp.where(yn > 0, yn, slope * yn).astype(o_ref.dtype)


def _convt_kernel(x_ref, w_ref, b_ref, o_ref, *, wp, mw):
    """Plain conv-transpose (3x3 correlation) + bias, identity activation."""
    taps = [x_ref[:, ky * wp + kx: ky * wp + kx + mw]
            for ky in range(3) for kx in range(3)]
    p = jnp.concatenate(taps, axis=0)
    y = jnp.dot(w_ref[...], p, preferred_element_type=jnp.float32)
    o_ref[...] = (y + b_ref[...]).astype(o_ref.dtype)


# ---------------------------------------------------------------------------
# JAX glue: padding / dilation / weight rewrite (all channel-major)
# ---------------------------------------------------------------------------
def _pad_dilate_flatten(x_nchw, stride, output_padding, k=3, padding=1):
    """(N,C,H,W) -> bf16 (N, C, (Hp+1)*Wp): zero-dilated + asymmetrically padded,
    spatially flattened, with one extra zero row so the last tap slice stays
    in bounds.  Single fused scatter under jit (no extra HBM round trips)."""
    N, C, H, W = x_nchw.shape
    pb = k - 1 - padding
    pa = k - 1 - padding + output_padding
    Hp = (H - 1) * stride + 1 + pb + pa
    Wp = (W - 1) * stride + 1 + pb + pa
    Ho, Wo = Hp - (k - 1), Wp - (k - 1)
    buf = jnp.zeros((N, C, Hp + 1, Wp), jnp.bfloat16)
    buf = buf.at[:, :,
                 pb:pb + (H - 1) * stride + 1:stride,
                 pb:pb + (W - 1) * stride + 1:stride].set(
        x_nchw.astype(jnp.bfloat16))
    return buf.reshape(N, C, (Hp + 1) * Wp), Hp, Wp, Ho, Wo


def _convt_weight_wt(w_pt):
    """PyTorch ConvTranspose2d weight (Cin, Cout, 3, 3) -> (Cout, 9*Cin) bf16
    forward-conv matrix (spatially flipped), rows blocked by tap (ky, kx)."""
    cin, cout, kh, kw = w_pt.shape
    wf = w_pt[:, :, ::-1, ::-1]                              # flip kH, kW
    return (wf.transpose(2, 3, 0, 1)
              .reshape(kh * kw * cin, cout).T
              .astype(jnp.bfloat16))


# ---------------------------------------------------------------------------
# Layer wrappers (pallas_call)
# ---------------------------------------------------------------------------
def convt_gn_lrelu(x_nchw, w_pt, b, gamma, beta, *, stride, output_padding,
                   groups=16, eps=1e-5, slope=0.2):
    xflat, Hp, Wp, Ho, Wo = _pad_dilate_flatten(x_nchw, stride, output_padding)
    N, Cin, Sp = xflat.shape
    Cout = w_pt.shape[1]
    Cg = Cout // groups
    Mw = Ho * Wp

    wt = _convt_weight_wt(w_pt)
    grp = jnp.arange(Cout) // Cg
    A = (grp[:, None] == grp[None, :]).astype(jnp.float32)   # (Cout, Cout)

    kernel = functools.partial(_convt_gn_lrelu_kernel, wp=Wp, wo=Wo, mw=Mw,
                               denom=float(Ho * Wo * Cg), eps=eps, slope=slope)
    flops = 2 * N * (9 * Cin) * Cout * Mw + 10 * N * Cout * Mw
    bytes_acc = (N * Cin * Sp * 2 + N * Cout * Mw * 2
                 + Cout * 9 * Cin * 2 + Cout * (Cout + 3) * 4)

    wide = pl.pallas_call(
        kernel,
        out_shape=jax.ShapeDtypeStruct((N, Cout, Mw), jnp.bfloat16),
        grid_spec=pltpu.PrefetchScalarGridSpec(
            num_scalar_prefetch=0,
            grid=(N,),
            in_specs=[
                pl.BlockSpec((None, Cin, Sp), lambda n: (n, 0, 0)),
                pl.BlockSpec((Cout, 9 * Cin), lambda n: (0, 0)),
                pl.BlockSpec((Cout, 1), lambda n: (0, 0)),
                pl.BlockSpec((Cout, Cout), lambda n: (0, 0)),
                pl.BlockSpec((Cout, 1), lambda n: (0, 0)),
                pl.BlockSpec((Cout, 1), lambda n: (0, 0)),
            ],
            out_specs=pl.BlockSpec((None, Cout, Mw), lambda n: (n, 0, 0)),
        ),
        compiler_params=pltpu.CompilerParams(
            dimension_semantics=("parallel",)),
        cost_estimate=pl.CostEstimate(flops=flops, transcendentals=N * Cout,
                                      bytes_accessed=bytes_acc),
    )(xflat, wt,
      b.reshape(Cout, 1).astype(jnp.float32), A,
      gamma.reshape(Cout, 1).astype(jnp.float32),
      beta.reshape(Cout, 1).astype(jnp.float32))

    # Drop the Wp-Wo junk columns per row (fuses into the next block's scatter).
    return wide.reshape(N, Cout, Ho, Wp)[:, :, :, :Wo]


def convt_plain(x_nchw, w_pt, b, *, stride, output_padding):
    xflat, Hp, Wp, Ho, Wo = _pad_dilate_flatten(x_nchw, stride, output_padding)
    N, Cin, Sp = xflat.shape
    Cout = w_pt.shape[1]
    Mw = Ho * Wp

    wt = _convt_weight_wt(w_pt)
    kernel = functools.partial(_convt_kernel, wp=Wp, mw=Mw)
    flops = 2 * N * (9 * Cin) * Cout * Mw
    bytes_acc = (N * Cin * Sp * 2 + N * Cout * Mw * 4
                 + Cout * 9 * Cin * 2 + Cout * 4)

    wide = pl.pallas_call(
        kernel,
        out_shape=jax.ShapeDtypeStruct((N, Cout, Mw), jnp.float32),
        grid_spec=pltpu.PrefetchScalarGridSpec(
            num_scalar_prefetch=0,
            grid=(N,),
            in_specs=[
                pl.BlockSpec((None, Cin, Sp), lambda n: (n, 0, 0)),
                pl.BlockSpec((Cout, 9 * Cin), lambda n: (0, 0)),
                pl.BlockSpec((Cout, 1), lambda n: (0, 0)),
            ],
            out_specs=pl.BlockSpec((None, Cout, Mw), lambda n: (n, 0, 0)),
        ),
        compiler_params=pltpu.CompilerParams(
            dimension_semantics=("parallel",)),
        cost_estimate=pl.CostEstimate(flops=flops, transcendentals=0,
                                      bytes_accessed=bytes_acc),
    )(xflat, wt, b.reshape(Cout, 1).astype(jnp.float32))

    return wide.reshape(N, Cout, Ho, Wp)[:, :, :, :Wo]


# ---------------------------------------------------------------------------
# DCGAN64Decoder forward (NCHW in, NCHW out; last_activation=None)
# ---------------------------------------------------------------------------
def dcgan64_decoder_forward(x_nchw, params):
    """x: (N, in_c, H, W) -> (N, out_c, 4H, 4W)."""
    # block 0: ConvTranspose2d(in_c, h_c, 3, 2, 1, output_padding=1) + GN(16) + LeakyReLU(0.2)
    x = convt_gn_lrelu(x_nchw, params["w0"], params["b0"], params["g0"],
                       params["be0"], stride=2, output_padding=1)
    # block 1: ConvTranspose2d(h_c, h_c, 3, 1, 1) + GN(16) + LeakyReLU(0.2)
    x = convt_gn_lrelu(x, params["w1"], params["b1"], params["g1"],
                       params["be1"], stride=1, output_padding=0)
    # block 2: ConvTranspose2d(h_c, out_c, 3, 2, 1, output_padding=1), identity
    x = convt_plain(x, params["w2"], params["b2"], stride=2, output_padding=1)
    return x


def init_params(key, in_c, out_c):
    h_c = in_c // 2
    ks = jax.random.split(key, 6)
    # ConvTranspose2d weight shape: (in_channels, out_channels, kH, kW)
    return {
        "w0": 0.1 * jax.random.normal(ks[0], (in_c, h_c, 3, 3), jnp.float32),
        "b0": 0.1 * jax.random.normal(ks[1], (h_c,), jnp.float32),
        "g0": jnp.ones((h_c,), jnp.float32),     # GroupNorm default affine
        "be0": jnp.zeros((h_c,), jnp.float32),
        "w1": 0.1 * jax.random.normal(ks[2], (h_c, h_c, 3, 3), jnp.float32),
        "b1": 0.1 * jax.random.normal(ks[3], (h_c,), jnp.float32),
        "g1": jnp.ones((h_c,), jnp.float32),
        "be1": jnp.zeros((h_c,), jnp.float32),
        "w2": 0.1 * jax.random.normal(ks[4], (h_c, out_c, 3, 3), jnp.float32),
        "b2": 0.1 * jax.random.normal(ks[5], (out_c,), jnp.float32),
    }


if __name__ == "__main__":
    # in_c must satisfy (in_c // 2) % 16 == 0 for GroupNorm(16, h_c)
    N, in_c, out_c, H, W = 2, 32, 4, 8, 8
    key = jax.random.PRNGKey(0)
    k_x, k_p = jax.random.split(key)
    x = jax.random.normal(k_x, (N, in_c, H, W), jnp.float32)   # NCHW input
    params = init_params(k_p, in_c, out_c)

    fwd = jax.jit(dcgan64_decoder_forward)
    out = fwd(x, params)
    jax.block_until_ready(out)
    assert out.shape == (N, out_c, 4 * H, 4 * W), out.shape
    assert out.dtype == jnp.float32
    assert bool(jnp.all(jnp.isfinite(out)))
    print("KERNEL_OK")
</pallas_src>

<mosaic_0001>
module attributes {stable_mosaic.version = 11 : i64} {
  func.func @_convt_gn_lrelu_kernel(%arg0: i32, %arg1: memref<1x32x342xbf16, #tpu.memory_space<vmem>>, %arg2: memref<16x288xbf16, #tpu.memory_space<vmem>>, %arg3: memref<16x1xf32, #tpu.memory_space<vmem>>, %arg4: memref<16x16xf32, #tpu.memory_space<vmem>>, %arg5: memref<16x1xf32, #tpu.memory_space<vmem>>, %arg6: memref<16x1xf32, #tpu.memory_space<vmem>>, %arg7: memref<1x16x288xbf16, #tpu.memory_space<vmem>>) attributes {dimension_semantics = [#tpu.dimension_semantics<parallel>], iteration_bounds = array<i64: 2>, scalar_prefetch = 0 : i64, scratch_operands = 0 : i64, tpu.core_type = #tpu.core_type<tc>, window_params = [{transform_indices = @transform_0, window_bounds = array<i64: 1, 32, 342>}, {pipeline_mode = #tpu.pipeline_mode<synchronous>, transform_indices = @transform_1, window_bounds = array<i64: 16, 288>}, {pipeline_mode = #tpu.pipeline_mode<synchronous>, transform_indices = @transform_2, window_bounds = array<i64: 16, 1>}, {pipeline_mode = #tpu.pipeline_mode<synchronous>, transform_indices = @transform_3, window_bounds = array<i64: 16, 16>}, {pipeline_mode = #tpu.pipeline_mode<synchronous>, transform_indices = @transform_4, window_bounds = array<i64: 16, 1>}, {pipeline_mode = #tpu.pipeline_mode<synchronous>, transform_indices = @transform_5, window_bounds = array<i64: 16, 1>}, {transform_indices = @transform_6, window_bounds = array<i64: 1, 16, 288>}]} {
    %c0 = arith.constant 0 : index
    %c0_0 = arith.constant 0 : index
    %c0_1 = arith.constant 0 : index
    %0 = vector.load %arg1[%c0, %c0_0, %c0_1] : memref<1x32x342xbf16, #tpu.memory_space<vmem>>, vector<1x32x288xbf16>
    %1 = vector.shape_cast %0 : vector<1x32x288xbf16> to vector<32x288xbf16>
    %c0_2 = arith.constant 0 : index
    %c0_3 = arith.constant 0 : index
    %c1 = arith.constant 1 : index
    %2 = vector.load %arg1[%c0_2, %c0_3, %c1] : memref<1x32x342xbf16, #tpu.memory_space<vmem>>, vector<1x32x288xbf16>
    %3 = vector.shape_cast %2 : vector<1x32x288xbf16> to vector<32x288xbf16>
    %c0_4 = arith.constant 0 : index
    %c0_5 = arith.constant 0 : index
    %c2 = arith.constant 2 : index
    %4 = vector.load %arg1[%c0_4, %c0_5, %c2] : memref<1x32x342xbf16, #tpu.memory_space<vmem>>, vector<1x32x288xbf16>
    %5 = vector.shape_cast %4 : vector<1x32x288xbf16> to vector<32x288xbf16>
    %c0_6 = arith.constant 0 : index
    %c0_7 = arith.constant 0 : index
    %c18 = arith.constant 18 : index
    %6 = vector.load %arg1[%c0_6, %c0_7, %c18] : memref<1x32x342xbf16, #tpu.memory_space<vmem>>, vector<1x32x288xbf16>
    %7 = vector.shape_cast %6 : vector<1x32x288xbf16> to vector<32x288xbf16>
    %c0_8 = arith.constant 0 : index
    %c0_9 = arith.constant 0 : index
    %c19 = arith.constant 19 : index
    %8 = vector.load %arg1[%c0_8, %c0_9, %c19] : memref<1x32x342xbf16, #tpu.memory_space<vmem>>, vector<1x32x288xbf16>
    %9 = vector.shape_cast %8 : vector<1x32x288xbf16> to vector<32x288xbf16>
    %c0_10 = arith.constant 0 : index
    %c0_11 = arith.constant 0 : index
    %c20 = arith.constant 20 : index
    %10 = vector.load %arg1[%c0_10, %c0_11, %c20] : memref<1x32x342xbf16, #tpu.memory_space<vmem>>, vector<1x32x288xbf16>
    %11 = vector.shape_cast %10 : vector<1x32x288xbf16> to vector<32x288xbf16>
    %c0_12 = arith.constant 0 : index
    %c0_13 = arith.constant 0 : index
    %c36 = arith.constant 36 : index
    %12 = vector.load %arg1[%c0_12, %c0_13, %c36] : memref<1x32x342xbf16, #tpu.memory_space<vmem>>, vector<1x32x288xbf16>
    %13 = vector.shape_cast %12 : vector<1x32x288xbf16> to vector<32x288xbf16>
    %c0_14 = arith.constant 0 : index
    %c0_15 = arith.constant 0 : index
    %c37 = arith.constant 37 : index
    %14 = vector.load %arg1[%c0_14, %c0_15, %c37] : memref<1x32x342xbf16, #tpu.memory_space<vmem>>, vector<1x32x288xbf16>
    %15 = vector.shape_cast %14 : vector<1x32x288xbf16> to vector<32x288xbf16>
    %c0_16 = arith.constant 0 : index
    %c0_17 = arith.constant 0 : index
    %c38 = arith.constant 38 : index
    %16 = vector.load %arg1[%c0_16, %c0_17, %c38] : memref<1x32x342xbf16, #tpu.memory_space<vmem>>, vector<1x32x288xbf16>
    %17 = vector.shape_cast %16 : vector<1x32x288xbf16> to vector<32x288xbf16>
    %18 = tpu.concatenate %1, %3, %5, %7, %9, %11, %13, %15, %17 in 0 : vector<32x288xbf16>, vector<32x288xbf16>, vector<32x288xbf16>, vector<32x288xbf16>, vector<32x288xbf16>, vector<32x288xbf16>, vector<32x288xbf16>, vector<32x288xbf16>, vector<32x288xbf16> -> vector<288x288xbf16>
    %c0_18 = arith.constant 0 : index
    %c0_19 = arith.constant 0 : index
    %19 = vector.load %arg2[%c0_18, %c0_19] : memref<16x288xbf16, #tpu.memory_space<vmem>>, vector<16x288xbf16>
    %cst = arith.constant dense<0.000000e+00> : vector<16x288xf32>
    %20 = tpu.matmul %19, %18, %cst {dimension_numbers = #tpu.dot_dimension_numbers<[1], [0], [0], [1], [0, 0, 1, 1], [], []>} : vector<16x288xbf16>, vector<288x288xbf16>, vector<16x288xf32> -> vector<16x288xf32>
    %c0_20 = arith.constant 0 : index
    %c0_21 = arith.constant 0 : index
    %21 = vector.load %arg3[%c0_20, %c0_21] : memref<16x1xf32, #tpu.memory_space<vmem>>, vector<16x1xf32>
    %22 = vector.broadcast %21 : vector<16x1xf32> to vector<16x288xf32>
    %23 = arith.addf %20, %22 : vector<16x288xf32>
    %24 = tpu.iota {dimensions = array<i32: 1>} : vector<1x288xi32>
    %c18_i32 = arith.constant 18 : i32
    %c0_i32 = arith.constant 0 : i32
    %25 = arith.cmpi eq, %c18_i32, %c0_i32 : i32
    %c1_i32 = arith.constant 1 : i32
    %26 = arith.select %25, %c1_i32, %c18_i32 : i32
    %27 = vector.broadcast %26 : i32 to vector<1x288xi32>
    %28 = arith.remsi %24, %27 : vector<1x288xi32>
    %c0_i32_22 = arith.constant 0 : i32
    %29 = vector.broadcast %c0_i32_22 : i32 to vector<1x288xi32>
    %30 = arith.cmpi ne, %28, %29 : vector<1x288xi32>
    %c0_i32_23 = arith.constant 0 : i32
    %31 = vector.broadcast %c0_i32_23 : i32 to vector<1x288xi32>
    %32 = arith.cmpi slt, %28, %31 : vector<1x288xi32>
    %c0_i32_24 = arith.constant 0 : i32
    %33 = arith.cmpi slt, %26, %c0_i32_24 : i32
    %34 = vector.broadcast %33 : i1 to vector<1x288xi1>
    %35 = vector.broadcast %34 : vector<1x288xi1> to vector<1x288xi1>
    %36 = arith.xori %32, %35 : vector<1x288xi1>
    %37 = arith.andi %36, %30 : vector<1x288xi1>
    %38 = vector.broadcast %26 : i32 to vector<1x288xi32>
    %39 = arith.addi %28, %38 : vector<1x288xi32>
    %40 = arith.select %37, %39, %28 : vector<1x288xi1>, vector<1x288xi32>
    %c16_i32 = arith.constant 16 : i32
    %41 = vector.broadcast %c16_i32 : i32 to vector<1x288xi32>
    %42 = arith.cmpi slt, %40, %41 : vector<1x288xi32>
    %cst_25 = arith.constant 0.000000e+00 : f32
    %43 = vector.shape_cast %42 : vector<1x288xi1> to vector<1x288xi1>
    %44 = vector.broadcast %43 : vector<1x288xi1> to vector<16x288xi1>
    %45 = vector.broadcast %cst_25 : f32 to vector<16x288xf32>
    %46 = arith.select %44, %23, %45 : vector<16x288xi1>, vector<16x288xf32>
    %cst_26 = arith.constant dense<0.000000e+00> : vector<16xf32>
    %47 = vector.multi_reduction <add>, %46, %cst_26 [1] : vector<16x288xf32> to vector<16xf32>
    %48 = vector.shape_cast %47 : vector<16xf32> to vector<16x1xf32>
    %c0_27 = arith.constant 0 : index
    %c0_28 = arith.constant 0 : index
    %49 = vector.load %arg4[%c0_27, %c0_28] : memref<16x16xf32, #tpu.memory_space<vmem>>, vector<16x16xf32>
    %cst_29 = arith.constant dense<0.000000e+00> : vector<16x1xf32>
    %50 = tpu.matmul %49, %48, %cst_29 {dimension_numbers = #tpu.dot_dimension_numbers<[1], [0], [0], [1], [0, 0, 1, 1], [], []>} : vector<16x16xf32>, vector<16x1xf32>, vector<16x1xf32> -> vector<16x1xf32>
    %cst_30 = arith.constant 2.560000e+02 : f32
    %51 = vector.broadcast %cst_30 : f32 to vector<16x1xf32>
    %52 = arith.divf %50, %51 : vector<16x1xf32>
    %53 = vector.broadcast %52 : vector<16x1xf32> to vector<16x288xf32>
    %54 = arith.subf %23, %53 : vector<16x288xf32>
    %cst_31 = arith.constant 0.000000e+00 : f32
    %55 = vector.shape_cast %42 : vector<1x288xi1> to vector<1x288xi1>
    %56 = vector.broadcast %55 : vector<1x288xi1> to vector<16x288xi1>
    %57 = vector.broadcast %cst_31 : f32 to vector<16x288xf32>
    %58 = arith.select %56, %54, %57 : vector<16x288xi1>, vector<16x288xf32>
    %59 = arith.mulf %58, %58 : vector<16x288xf32>
    %cst_32 = arith.constant dense<0.000000e+00> : vector<16xf32>
    %60 = vector.multi_reduction <add>, %59, %cst_32 [1] : vector<16x288xf32> to vector<16xf32>
    %61 = vector.shape_cast %60 : vector<16xf32> to vector<16x1xf32>
    %c0_33 = arith.constant 0 : index
    %c0_34 = arith.constant 0 : index
    %62 = vector.load %arg4[%c0_33, %c0_34] : memref<16x16xf32, #tpu.memory_space<vmem>>, vector<16x16xf32>
    %cst_35 = arith.constant dense<0.000000e+00> : vector<16x1xf32>
    %63 = tpu.matmul %62, %61, %cst_35 {dimension_numbers = #tpu.dot_dimension_numbers<[1], [0], [0], [1], [0, 0, 1, 1], [], []>} : vector<16x16xf32>, vector<16x1xf32>, vector<16x1xf32> -> vector<16x1xf32>
    %cst_36 = arith.constant 2.560000e+02 : f32
    %64 = vector.broadcast %cst_36 : f32 to vector<16x1xf32>
    %65 = arith.divf %63, %64 : vector<16x1xf32>
    %cst_37 = arith.constant 9.99999974E-6 : f32
    %66 = vector.broadcast %cst_37 : f32 to vector<16x1xf32>
    %67 = arith.addf %65, %66 : vector<16x1xf32>
    %68 = math.rsqrt %67 : vector<16x1xf32>
    %69 = vector.broadcast %52 : vector<16x1xf32> to vector<16x288xf32>
    %70 = arith.subf %23, %69 : vector<16x288xf32>
    %c0_38 = arith.constant 0 : index
    %c0_39 = arith.constant 0 : index
    %71 = vector.load %arg5[%c0_38, %c0_39] : memref<16x1xf32, #tpu.memory_space<vmem>>, vector<16x1xf32>
    %72 = arith.mulf %68, %71 : vector<16x1xf32>
    %73 = vector.broadcast %72 : vector<16x1xf32> to vector<16x288xf32>
    %74 = arith.mulf %70, %73 : vector<16x288xf32>
    %c0_40 = arith.constant 0 : index
    %c0_41 = arith.constant 0 : index
    %75 = vector.load %arg6[%c0_40, %c0_41] : memref<16x1xf32, #tpu.memory_space<vmem>>, vector<16x1xf32>
    %76 = vector.broadcast %75 : vector<16x1xf32> to vector<16x288xf32>
    %77 = arith.addf %74, %76 : vector<16x288xf32>
    %cst_42 = arith.constant 0.000000e+00 : f32
    %78 = vector.broadcast %cst_42 : f32 to vector<16x288xf32>
    %79 = arith.cmpf ogt, %77, %78 : vector<16x288xf32>
    %cst_43 = arith.constant 2.000000e-01 : f32
    %80 = vector.broadcast %cst_43 : f32 to vector<16x288xf32>
    %81 = arith.mulf %80, %77 : vector<16x288xf32>
    %82 = arith.select %79, %77, %81 : vector<16x288xi1>, vector<16x288xf32>
    %83 = arith.truncf %82 : vector<16x288xf32> to vector<16x288xbf16>
    %c0_44 = arith.constant 0 : index
    %c0_45 = arith.constant 0 : index
    %c0_46 = arith.constant 0 : index
    %84 = vector.load %arg7[%c0_44, %c0_45, %c0_46] : memref<1x16x288xbf16, #tpu.memory_space<vmem>>, vector<1x16x288xbf16>
    %85 = vector.shape_cast %84 : vector<1x16x288xbf16> to vector<16x288xbf16>
    %86 = vector.shape_cast %83 : vector<16x288xbf16> to vector<1x16x288xbf16>
    tpu.vector_store %arg7[%c0_44, %c0_45, %c0_46], %86 {strides = array<i32>} : memref<1x16x288xbf16, #tpu.memory_space<vmem>>, vector<1x16x288xbf16>,
    return
  }
  func.func @transform_0(%arg0: i32) -> (i32, i32, i32) {
    %c0_i32 = arith.constant 0 : i32
    %c0_i32_0 = arith.constant 0 : i32
    %c0_i32_1 = arith.constant 0 : i32
    return %arg0, %c0_i32, %c0_i32_0 : i32, i32, i32
  }
  func.func @transform_1(%arg0: i32) -> (i32, i32) {
    %c0_i32 = arith.constant 0 : i32
    %c0_i32_0 = arith.constant 0 : i32
    %c0_i32_1 = arith.constant 0 : i32
    return %c0_i32, %c0_i32_0 : i32, i32
  }
  func.func @transform_2(%arg0: i32) -> (i32, i32) {
    %c0_i32 = arith.constant 0 : i32
    %c0_i32_0 = arith.constant 0 : i32
    %c0_i32_1 = arith.constant 0 : i32
    return %c0_i32, %c0_i32_0 : i32, i32
  }
  func.func @transform_3(%arg0: i32) -> (i32, i32) {
    %c0_i32 = arith.constant 0 : i32
    %c0_i32_0 = arith.constant 0 : i32
    %c0_i32_1 = arith.constant 0 : i32
    return %c0_i32, %c0_i32_0 : i32, i32
  }
  func.func @transform_4(%arg0: i32) -> (i32, i32) {
    %c0_i32 = arith.constant 0 : i32
    %c0_i32_0 = arith.constant 0 : i32
    %c0_i32_1 = arith.constant 0 : i32
    return %c0_i32, %c0_i32_0 : i32, i32
  }
  func.func @transform_5(%arg0: i32) -> (i32, i32) {
    %c0_i32 = arith.constant 0 : i32
    %c0_i32_0 = arith.constant 0 : i32
    %c0_i32_1 = arith.constant 0 : i32
    return %c0_i32, %c0_i32_0 : i32, i32
  }
  func.func @transform_6(%arg0: i32) -> (i32, i32, i32) {
    %c0_i32 = arith.constant 0 : i32
    %c0_i32_0 = arith.constant 0 : i32
    %c0_i32_1 = arith.constant 0 : i32
    return %arg0, %c0_i32, %c0_i32_0 : i32, i32, i32
  }
}

module attributes {stable_mosaic.version = 11 : i64} {
  func.func @_convt_gn_lrelu_kernel(%arg0: i32, %arg1: memref<1x16x342xbf16, #tpu.memory_space<vmem>>, %arg2: memref<16x144xbf16, #tpu.memory_space<vmem>>, %arg3: memref<16x1xf32, #tpu.memory_space<vmem>>, %arg4: memref<16x16xf32, #tpu.memory_space<vmem>>, %arg5: memref<16x1xf32, #tpu.memory_space<vmem>>, %arg6: memref<16x1xf32, #tpu.memory_space<vmem>>, %arg7: memref<1x16x288xbf16, #tpu.memory_space<vmem>>) attributes {dimension_semantics = [#tpu.dimension_semantics<parallel>], iteration_bounds = array<i64: 2>, scalar_prefetch = 0 : i64, scratch_operands = 0 : i64, tpu.core_type = #tpu.core_type<tc>, window_params = [{transform_indices = @transform_0, window_bounds = array<i64: 1, 16, 342>}, {pipeline_mode = #tpu.pipeline_mode<synchronous>, transform_indices = @transform_1, window_bounds = array<i64: 16, 144>}, {pipeline_mode = #tpu.pipeline_mode<synchronous>, transform_indices = @transform_2, window_bounds = array<i64: 16, 1>}, {pipeline_mode = #tpu.pipeline_mode<synchronous>, transform_indices = @transform_3, window_bounds = array<i64: 16, 16>}, {pipeline_mode = #tpu.pipeline_mode<synchronous>, transform_indices = @transform_4, window_bounds = array<i64: 16, 1>}, {pipeline_mode = #tpu.pipeline_mode<synchronous>, transform_indices = @transform_5, window_bounds = array<i64: 16, 1>}, {transform_indices = @transform_6, window_bounds = array<i64: 1, 16, 288>}]} {
    %c0 = arith.constant 0 : index
    %c0_0 = arith.constant 0 : index
    %c0_1 = arith.constant 0 : index
    %0 = vector.load %arg1[%c0, %c0_0, %c0_1] : memref<1x16x342xbf16, #tpu.memory_space<vmem>>, vector<1x16x288xbf16>
    %1 = vector.shape_cast %0 : vector<1x16x288xbf16> to vector<16x288xbf16>
    %c0_2 = arith.constant 0 : index
    %c0_3 = arith.constant 0 : index
    %c1 = arith.constant 1 : index
    %2 = vector.load %arg1[%c0_2, %c0_3, %c1] : memref<1x16x342xbf16, #tpu.memory_space<vmem>>, vector<1x16x288xbf16>
    %3 = vector.shape_cast %2 : vector<1x16x288xbf16> to vector<16x288xbf16>
    %c0_4 = arith.constant 0 : index
    %c0_5 = arith.constant 0 : index
    %c2 = arith.constant 2 : index
    %4 = vector.load %arg1[%c0_4, %c0_5, %c2] : memref<1x16x342xbf16, #tpu.memory_space<vmem>>, vector<1x16x288xbf16>
    %5 = vector.shape_cast %4 : vector<1x16x288xbf16> to vector<16x288xbf16>
    %c0_6 = arith.constant 0 : index
    %c0_7 = arith.constant 0 : index
    %c18 = arith.constant 18 : index
    %6 = vector.load %arg1[%c0_6, %c0_7, %c18] : memref<1x16x342xbf16, #tpu.memory_space<vmem>>, vector<1x16x288xbf16>
    %7 = vector.shape_cast %6 : vector<1x16x288xbf16> to vector<16x288xbf16>
    %c0_8 = arith.constant 0 : index
    %c0_9 = arith.constant 0 : index
    %c19 = arith.constant 19 : index
    %8 = vector.load %arg1[%c0_8, %c0_9, %c19] : memref<1x16x342xbf16, #tpu.memory_space<vmem>>, vector<1x16x288xbf16>
    %9 = vector.shape_cast %8 : vector<1x16x288xbf16> to vector<16x288xbf16>
    %c0_10 = arith.constant 0 : index
    %c0_11 = arith.constant 0 : index
    %c20 = arith.constant 20 : index
    %10 = vector.load %arg1[%c0_10, %c0_11, %c20] : memref<1x16x342xbf16, #tpu.memory_space<vmem>>, vector<1x16x288xbf16>
    %11 = vector.shape_cast %10 : vector<1x16x288xbf16> to vector<16x288xbf16>
    %c0_12 = arith.constant 0 : index
    %c0_13 = arith.constant 0 : index
    %c36 = arith.constant 36 : index
    %12 = vector.load %arg1[%c0_12, %c0_13, %c36] : memref<1x16x342xbf16, #tpu.memory_space<vmem>>, vector<1x16x288xbf16>
    %13 = vector.shape_cast %12 : vector<1x16x288xbf16> to vector<16x288xbf16>
    %c0_14 = arith.constant 0 : index
    %c0_15 = arith.constant 0 : index
    %c37 = arith.constant 37 : index
    %14 = vector.load %arg1[%c0_14, %c0_15, %c37] : memref<1x16x342xbf16, #tpu.memory_space<vmem>>, vector<1x16x288xbf16>
    %15 = vector.shape_cast %14 : vector<1x16x288xbf16> to vector<16x288xbf16>
    %c0_16 = arith.constant 0 : index
    %c0_17 = arith.constant 0 : index
    %c38 = arith.constant 38 : index
    %16 = vector.load %arg1[%c0_16, %c0_17, %c38] : memref<1x16x342xbf16, #tpu.memory_space<vmem>>, vector<1x16x288xbf16>
    %17 = vector.shape_cast %16 : vector<1x16x288xbf16> to vector<16x288xbf16>
    %18 = tpu.concatenate %1, %3, %5, %7, %9, %11, %13, %15, %17 in 0 : vector<16x288xbf16>, vector<16x288xbf16>, vector<16x288xbf16>, vector<16x288xbf16>, vector<16x288xbf16>, vector<16x288xbf16>, vector<16x288xbf16>, vector<16x288xbf16>, vector<16x288xbf16> -> vector<144x288xbf16>
    %c0_18 = arith.constant 0 : index
    %c0_19 = arith.constant 0 : index
    %19 = vector.load %arg2[%c0_18, %c0_19] : memref<16x144xbf16, #tpu.memory_space<vmem>>, vector<16x144xbf16>
    %cst = arith.constant dense<0.000000e+00> : vector<16x288xf32>
    %20 = tpu.matmul %19, %18, %cst {dimension_numbers = #tpu.dot_dimension_numbers<[1], [0], [0], [1], [0, 0, 1, 1], [], []>} : vector<16x144xbf16>, vector<144x288xbf16>, vector<16x288xf32> -> vector<16x288xf32>
    %c0_20 = arith.constant 0 : index
    %c0_21 = arith.constant 0 : index
    %21 = vector.load %arg3[%c0_20, %c0_21] : memref<16x1xf32, #tpu.memory_space<vmem>>, vector<16x1xf32>
    %22 = vector.broadcast %21 : vector<16x1xf32> to vector<16x288xf32>
    %23 = arith.addf %20, %22 : vector<16x288xf32>
    %24 = tpu.iota {dimensions = array<i32: 1>} : vector<1x288xi32>
    %c18_i32 = arith.constant 18 : i32
    %c0_i32 = arith.constant 0 : i32
    %25 = arith.cmpi eq, %c18_i32, %c0_i32 : i32
    %c1_i32 = arith.constant 1 : i32
    %26 = arith.select %25, %c1_i32, %c18_i32 : i32
    %27 = vector.broadcast %26 : i32 to vector<1x288xi32>
    %28 = arith.remsi %24, %27 : vector<1x288xi32>
    %c0_i32_22 = arith.constant 0 : i32
    %29 = vector.broadcast %c0_i32_22 : i32 to vector<1x288xi32>
    %30 = arith.cmpi ne, %28, %29 : vector<1x288xi32>
    %c0_i32_23 = arith.constant 0 : i32
    %31 = vector.broadcast %c0_i32_23 : i32 to vector<1x288xi32>
    %32 = arith.cmpi slt, %28, %31 : vector<1x288xi32>
    %c0_i32_24 = arith.constant 0 : i32
    %33 = arith.cmpi slt, %26, %c0_i32_24 : i32
    %34 = vector.broadcast %33 : i1 to vector<1x288xi1>
    %35 = vector.broadcast %34 : vector<1x288xi1> to vector<1x288xi1>
    %36 = arith.xori %32, %35 : vector<1x288xi1>
    %37 = arith.andi %36, %30 : vector<1x288xi1>
    %38 = vector.broadcast %26 : i32 to vector<1x288xi32>
    %39 = arith.addi %28, %38 : vector<1x288xi32>
    %40 = arith.select %37, %39, %28 : vector<1x288xi1>, vector<1x288xi32>
    %c16_i32 = arith.constant 16 : i32
    %41 = vector.broadcast %c16_i32 : i32 to vector<1x288xi32>
    %42 = arith.cmpi slt, %40, %41 : vector<1x288xi32>
    %cst_25 = arith.constant 0.000000e+00 : f32
    %43 = vector.shape_cast %42 : vector<1x288xi1> to vector<1x288xi1>
    %44 = vector.broadcast %43 : vector<1x288xi1> to vector<16x288xi1>
    %45 = vector.broadcast %cst_25 : f32 to vector<16x288xf32>
    %46 = arith.select %44, %23, %45 : vector<16x288xi1>, vector<16x288xf32>
    %cst_26 = arith.constant dense<0.000000e+00> : vector<16xf32>
    %47 = vector.multi_reduction <add>, %46, %cst_26 [1] : vector<16x288xf32> to vector<16xf32>
    %48 = vector.shape_cast %47 : vector<16xf32> to vector<16x1xf32>
    %c0_27 = arith.constant 0 : index
    %c0_28 = arith.constant 0 : index
    %49 = vector.load %arg4[%c0_27, %c0_28] : memref<16x16xf32, #tpu.memory_space<vmem>>, vector<16x16xf32>
    %cst_29 = arith.constant dense<0.000000e+00> : vector<16x1xf32>
    %50 = tpu.matmul %49, %48, %cst_29 {dimension_numbers = #tpu.dot_dimension_numbers<[1], [0], [0], [1], [0, 0, 1, 1], [], []>} : vector<16x16xf32>, vector<16x1xf32>, vector<16x1xf32> -> vector<16x1xf32>
    %cst_30 = arith.constant 2.560000e+02 : f32
    %51 = vector.broadcast %cst_30 : f32 to vector<16x1xf32>
    %52 = arith.divf %50, %51 : vector<16x1xf32>
    %53 = vector.broadcast %52 : vector<16x1xf32> to vector<16x288xf32>
    %54 = arith.subf %23, %53 : vector<16x288xf32>
    %cst_31 = arith.constant 0.000000e+00 : f32
    %55 = vector.shape_cast %42 : vector<1x288xi1> to vector<1x288xi1>
    %56 = vector.broadcast %55 : vector<1x288xi1> to vector<16x288xi1>
    %57 = vector.broadcast %cst_31 : f32 to vector<16x288xf32>
    %58 = arith.select %56, %54, %57 : vector<16x288xi1>, vector<16x288xf32>
    %59 = arith.mulf %58, %58 : vector<16x288xf32>
    %cst_32 = arith.constant dense<0.000000e+00> : vector<16xf32>
    %60 = vector.multi_reduction <add>, %59, %cst_32 [1] : vector<16x288xf32> to vector<16xf32>
    %61 = vector.shape_cast %60 : vector<16xf32> to vector<16x1xf32>
    %c0_33 = arith.constant 0 : index
    %c0_34 = arith.constant 0 : index
    %62 = vector.load %arg4[%c0_33, %c0_34] : memref<16x16xf32, #tpu.memory_space<vmem>>, vector<16x16xf32>
    %cst_35 = arith.constant dense<0.000000e+00> : vector<16x1xf32>
    %63 = tpu.matmul %62, %61, %cst_35 {dimension_numbers = #tpu.dot_dimension_numbers<[1], [0], [0], [1], [0, 0, 1, 1], [], []>} : vector<16x16xf32>, vector<16x1xf32>, vector<16x1xf32> -> vector<16x1xf32>
    %cst_36 = arith.constant 2.560000e+02 : f32
    %64 = vector.broadcast %cst_36 : f32 to vector<16x1xf32>
    %65 = arith.divf %63, %64 : vector<16x1xf32>
    %cst_37 = arith.constant 9.99999974E-6 : f32
    %66 = vector.broadcast %cst_37 : f32 to vector<16x1xf32>
    %67 = arith.addf %65, %66 : vector<16x1xf32>
    %68 = math.rsqrt %67 : vector<16x1xf32>
    %69 = vector.broadcast %52 : vector<16x1xf32> to vector<16x288xf32>
    %70 = arith.subf %23, %69 : vector<16x288xf32>
    %c0_38 = arith.constant 0 : index
    %c0_39 = arith.constant 0 : index
    %71 = vector.load %arg5[%c0_38, %c0_39] : memref<16x1xf32, #tpu.memory_space<vmem>>, vector<16x1xf32>
    %72 = arith.mulf %68, %71 : vector<16x1xf32>
    %73 = vector.broadcast %72 : vector<16x1xf32> to vector<16x288xf32>
    %74 = arith.mulf %70, %73 : vector<16x288xf32>
    %c0_40 = arith.constant 0 : index
    %c0_41 = arith.constant 0 : index
    %75 = vector.load %arg6[%c0_40, %c0_41] : memref<16x1xf32, #tpu.memory_space<vmem>>, vector<16x1xf32>
    %76 = vector.broadcast %75 : vector<16x1xf32> to vector<16x288xf32>
    %77 = arith.addf %74, %76 : vector<16x288xf32>
    %cst_42 = arith.constant 0.000000e+00 : f32
    %78 = vector.broadcast %cst_42 : f32 to vector<16x288xf32>
    %79 = arith.cmpf ogt, %77, %78 : vector<16x288xf32>
    %cst_43 = arith.constant 2.000000e-01 : f32
    %80 = vector.broadcast %cst_43 : f32 to vector<16x288xf32>
    %81 = arith.mulf %80, %77 : vector<16x288xf32>
    %82 = arith.select %79, %77, %81 : vector<16x288xi1>, vector<16x288xf32>
    %83 = arith.truncf %82 : vector<16x288xf32> to vector<16x288xbf16>
    %c0_44 = arith.constant 0 : index
    %c0_45 = arith.constant 0 : index
    %c0_46 = arith.constant 0 : index
    %84 = vector.load %arg7[%c0_44, %c0_45, %c0_46] : memref<1x16x288xbf16, #tpu.memory_space<vmem>>, vector<1x16x288xbf16>
    %85 = vector.shape_cast %84 : vector<1x16x288xbf16> to vector<16x288xbf16>
    %86 = vector.shape_cast %83 : vector<16x288xbf16> to vector<1x16x288xbf16>
    tpu.vector_store %arg7[%c0_44, %c0_45, %c0_46], %86 {strides = array<i32>} : memref<1x16x288xbf16, #tpu.memory_space<vmem>>, vector<1x16x288xbf16>,
    return
  }
  func.func @transform_0(%arg0: i32) -> (i32, i32, i32) {
    %c0_i32 = arith.constant 0 : i32
    %c0_i32_0 = arith.constant 0 : i32
    %c0_i32_1 = arith.constant 0 : i32
    return %arg0, %c0_i32, %c0_i32_0 : i32, i32, i32
  }
  func.func @transform_1(%arg0: i32) -> (i32, i32) {
    %c0_i32 = arith.constant 0 : i32
    %c0_i32_0 = arith.constant 0 : i32
    %c0_i32_1 = arith.constant 0 : i32
    return %c0_i32, %c0_i32_0 : i32, i32
  }
  func.func @transform_2(%arg0: i32) -> (i32, i32) {
    %c0_i32 = arith.constant 0 : i32
    %c0_i32_0 = arith.constant 0 : i32
    %c0_i32_1 = arith.constant 0 : i32
    return %c0_i32, %c0_i32_0 : i32, i32
  }
  func.func @transform_3(%arg0: i32) -> (i32, i32) {
    %c0_i32 = arith.constant 0 : i32
    %c0_i32_0 = arith.constant 0 : i32
    %c0_i32_1 = arith.constant 0 : i32
    return %c0_i32, %c0_i32_0 : i32, i32
  }
  func.func @transform_4(%arg0: i32) -> (i32, i32) {
    %c0_i32 = arith.constant 0 : i32
    %c0_i32_0 = arith.constant 0 : i32
    %c0_i32_1 = arith.constant 0 : i32
    return %c0_i32, %c0_i32_0 : i32, i32
  }
  func.func @transform_5(%arg0: i32) -> (i32, i32) {
    %c0_i32 = arith.constant 0 : i32
    %c0_i32_0 = arith.constant 0 : i32
    %c0_i32_1 = arith.constant 0 : i32
    return %c0_i32, %c0_i32_0 : i32, i32
  }
  func.func @transform_6(%arg0: i32) -> (i32, i32, i32) {
    %c0_i32 = arith.constant 0 : i32
    %c0_i32_0 = arith.constant 0 : i32
    %c0_i32_1 = arith.constant 0 : i32
    return %arg0, %c0_i32, %c0_i32_0 : i32, i32, i32
  }
}

module attributes {stable_mosaic.version = 11 : i64} {
  func.func @_convt_kernel(%arg0: i32, %arg1: memref<1x16x1190xbf16, #tpu.memory_space<vmem>>, %arg2: memref<4x144xbf16, #tpu.memory_space<vmem>>, %arg3: memref<4x1xf32, #tpu.memory_space<vmem>>, %arg4: memref<1x4x1088xf32, #tpu.memory_space<vmem>>) attributes {dimension_semantics = [#tpu.dimension_semantics<parallel>], iteration_bounds = array<i64: 2>, scalar_prefetch = 0 : i64, scratch_operands = 0 : i64, tpu.core_type = #tpu.core_type<tc>, window_params = [{transform_indices = @transform_0, window_bounds = array<i64: 1, 16, 1190>}, {pipeline_mode = #tpu.pipeline_mode<synchronous>, transform_indices = @transform_1, window_bounds = array<i64: 4, 144>}, {pipeline_mode = #tpu.pipeline_mode<synchronous>, transform_indices = @transform_2, window_bounds = array<i64: 4, 1>}, {transform_indices = @transform_3, window_bounds = array<i64: 1, 4, 1088>}]} {
    %c0 = arith.constant 0 : index
    %c0_0 = arith.constant 0 : index
    %c0_1 = arith.constant 0 : index
    %0 = vector.load %arg1[%c0, %c0_0, %c0_1] : memref<1x16x1190xbf16, #tpu.memory_space<vmem>>, vector<1x16x1088xbf16>
    %1 = vector.shape_cast %0 : vector<1x16x1088xbf16> to vector<16x1088xbf16>
    %c0_2 = arith.constant 0 : index
    %c0_3 = arith.constant 0 : index
    %c1 = arith.constant 1 : index
    %2 = vector.load %arg1[%c0_2, %c0_3, %c1] : memref<1x16x1190xbf16, #tpu.memory_space<vmem>>, vector<1x16x1088xbf16>
    %3 = vector.shape_cast %2 : vector<1x16x1088xbf16> to vector<16x1088xbf16>
    %c0_4 = arith.constant 0 : index
    %c0_5 = arith.constant 0 : index
    %c2 = arith.constant 2 : index
    %4 = vector.load %arg1[%c0_4, %c0_5, %c2] : memref<1x16x1190xbf16, #tpu.memory_space<vmem>>, vector<1x16x1088xbf16>
    %5 = vector.shape_cast %4 : vector<1x16x1088xbf16> to vector<16x1088xbf16>
    %c0_6 = arith.constant 0 : index
    %c0_7 = arith.constant 0 : index
    %c34 = arith.constant 34 : index
    %6 = vector.load %arg1[%c0_6, %c0_7, %c34] : memref<1x16x1190xbf16, #tpu.memory_space<vmem>>, vector<1x16x1088xbf16>
    %7 = vector.shape_cast %6 : vector<1x16x1088xbf16> to vector<16x1088xbf16>
    %c0_8 = arith.constant 0 : index
    %c0_9 = arith.constant 0 : index
    %c35 = arith.constant 35 : index
    %8 = vector.load %arg1[%c0_8, %c0_9, %c35] : memref<1x16x1190xbf16, #tpu.memory_space<vmem>>, vector<1x16x1088xbf16>
    %9 = vector.shape_cast %8 : vector<1x16x1088xbf16> to vector<16x1088xbf16>
    %c0_10 = arith.constant 0 : index
    %c0_11 = arith.constant 0 : index
    %c36 = arith.constant 36 : index
    %10 = vector.load %arg1[%c0_10, %c0_11, %c36] : memref<1x16x1190xbf16, #tpu.memory_space<vmem>>, vector<1x16x1088xbf16>
    %11 = vector.shape_cast %10 : vector<1x16x1088xbf16> to vector<16x1088xbf16>
    %c0_12 = arith.constant 0 : index
    %c0_13 = arith.constant 0 : index
    %c68 = arith.constant 68 : index
    %12 = vector.load %arg1[%c0_12, %c0_13, %c68] : memref<1x16x1190xbf16, #tpu.memory_space<vmem>>, vector<1x16x1088xbf16>
    %13 = vector.shape_cast %12 : vector<1x16x1088xbf16> to vector<16x1088xbf16>
    %c0_14 = arith.constant 0 : index
    %c0_15 = arith.constant 0 : index
    %c69 = arith.constant 69 : index
    %14 = vector.load %arg1[%c0_14, %c0_15, %c69] : memref<1x16x1190xbf16, #tpu.memory_space<vmem>>, vector<1x16x1088xbf16>
    %15 = vector.shape_cast %14 : vector<1x16x1088xbf16> to vector<16x1088xbf16>
    %c0_16 = arith.constant 0 : index
    %c0_17 = arith.constant 0 : index
    %c70 = arith.constant 70 : index
    %16 = vector.load %arg1[%c0_16, %c0_17, %c70] : memref<1x16x1190xbf16, #tpu.memory_space<vmem>>, vector<1x16x1088xbf16>
    %17 = vector.shape_cast %16 : vector<1x16x1088xbf16> to vector<16x1088xbf16>
    %18 = tpu.concatenate %1, %3, %5, %7, %9, %11, %13, %15, %17 in 0 : vector<16x1088xbf16>, vector<16x1088xbf16>, vector<16x1088xbf16>, vector<16x1088xbf16>, vector<16x1088xbf16>, vector<16x1088xbf16>, vector<16x1088xbf16>, vector<16x1088xbf16>, vector<16x1088xbf16> -> vector<144x1088xbf16>
    %c0_18 = arith.constant 0 : index
    %c0_19 = arith.constant 0 : index
    %19 = vector.load %arg2[%c0_18, %c0_19] : memref<4x144xbf16, #tpu.memory_space<vmem>>, vector<4x144xbf16>
    %cst = arith.constant dense<0.000000e+00> : vector<4x1088xf32>
    %20 = tpu.matmul %19, %18, %cst {dimension_numbers = #tpu.dot_dimension_numbers<[1], [0], [0], [1], [0, 0, 1, 1], [], []>} : vector<4x144xbf16>, vector<144x1088xbf16>, vector<4x1088xf32> -> vector<4x1088xf32>
    %c0_20 = arith.constant 0 : index
    %c0_21 = arith.constant 0 : index
    %21 = vector.load %arg3[%c0_20, %c0_21] : memref<4x1xf32, #tpu.memory_space<vmem>>, vector<4x1xf32>
    %22 = vector.broadcast %21 : vector<4x1xf32> to vector<4x1088xf32>
    %23 = arith.addf %20, %22 : vector<4x1088xf32>
    %c0_22 = arith.constant 0 : index
    %c0_23 = arith.constant 0 : index
    %c0_24 = arith.constant 0 : index
    %24 = vector.load %arg4[%c0_22, %c0_23, %c0_24] : memref<1x4x1088xf32, #tpu.memory_space<vmem>>, vector<1x4x1088xf32>
    %25 = vector.shape_cast %24 : vector<1x4x1088xf32> to vector<4x1088xf32>
    %26 = vector.shape_cast %23 : vector<4x1088xf32> to vector<1x4x1088xf32>
    tpu.vector_store %arg4[%c0_22, %c0_23, %c0_24], %26 {strides = array<i32>} : memref<1x4x1088xf32, #tpu.memory_space<vmem>>, vector<1x4x1088xf32>,
    return
  }
  func.func @transform_0(%arg0: i32) -> (i32, i32, i32) {
    %c0_i32 = arith.constant 0 : i32
    %c0_i32_0 = arith.constant 0 : i32
    %c0_i32_1 = arith.constant 0 : i32
    return %arg0, %c0_i32, %c0_i32_0 : i32, i32, i32
  }
  func.func @transform_1(%arg0: i32) -> (i32, i32) {
    %c0_i32 = arith.constant 0 : i32
    %c0_i32_0 = arith.constant 0 : i32
    %c0_i32_1 = arith.constant 0 : i32
    return %c0_i32, %c0_i32_0 : i32, i32
  }
  func.func @transform_2(%arg0: i32) -> (i32, i32) {
    %c0_i32 = arith.constant 0 : i32
    %c0_i32_0 = arith.constant 0 : i32
    %c0_i32_1 = arith.constant 0 : i32
    return %c0_i32, %c0_i32_0 : i32, i32
  }
  func.func @transform_3(%arg0: i32) -> (i32, i32, i32) {
    %c0_i32 = arith.constant 0 : i32
    %c0_i32_0 = arith.constant 0 : i32
    %c0_i32_1 = arith.constant 0 : i32
    return %arg0, %c0_i32, %c0_i32_0 : i32, i32, i32
  }
}

</mosaic_0001>

<bundles_post_ra>
// kernel: dcgan64_decoder_forward.4
= control target key start
LH: loop header
LB: loop body
LE: loop exit
PB: predicated region body
PF: predicated region fallthrough
CT: control target
= control target key end

     0   :  { %s1046_s21 = smov 0   ;;  %s1169_s0 = inlined_call_operand.vmem [shape: bf16[2,16,342], index: 0, kind: input, shape index: {}]   ;;  %s1170_s1 = inlined_call_operand.vmem [shape: bf16[16,144], index: 1, kind: input, shape index: {}]   ;;  %s1171_s2 = inlined_call_operand.vmem [shape: f32[16,1], index: 2, kind: input, shape index: {}]   ;;  %s1172_s3 = inlined_call_operand.vmem [shape: f32[16,16], index: 3, kind: input, shape index: {}]   ;;  %s1173_s4 = inlined_call_operand.vmem [shape: f32[16,1], index: 4, kind: input, shape index: {}]   ;;  %s1174_s5 = inlined_call_operand.vmem [shape: f32[16,1], index: 5, kind: input, shape index: {}]   ;;  %s1175_s6 = inlined_call_operand.vmem [shape: bf16[2,16,288], index: 6, kind: output, shape index: {}]  }
   0x1 LB: > { %s899_s22 = sadd.s32 4294967295, %s1000_s21   ;;  %p903_p0 = scmp.ge.s32.totalorder %s1000_s21, 1  ;;  %s1000_s21 = sphi %s1046_s21, %s16_s21  }
   0x2   : > { %p212_p1 = scmp.lt.s32.totalorder %s1000_s21, 3 }
   0x4   : > { %p213_p2 = pnand %p903_p0, %p212_p1 }
   0x5   : > { %p242_p3 = scmp.lt.s32.totalorder (!%p213_p2), %s899_s22, 1  ;;  %v1002_v0 = vmov (!%p213_p2), 0   ;;  %s1003_s27 = smov (!%p213_p2), 127   ;;  %v989_v4 = vld [vmem:[%s1170_s1 + $0x4] ss:$8 sps:$4 sm:$0xff] (!%p213_p2)   ;;  %vm392_vm0 = vcmask (!%p213_p2), 130048   ;;  %v480_v48 = vlaneseq (!%p213_p2) }
   0x6   : > { %216 = sbr.rel (%p213_p2) target bundleno = 1424 (0x590), region = 44  ;;  %439 = vmatprep.subr.bf16.mxu1 (!%p213_p2), %v1002_v0  ;;  %981 = vset.pattern.permute.xlu0 (!%p213_p2), %v1002_v0  ;;  %s1004_s28 = smov (!%p213_p2), 126   ;;  %v371_v5 = vld [vmem:[%s1171_s2] sm:$0xff] (!%p213_p2)  ;;  %v372_v6 = vld [vmem:[%s1171_s2 + $0x8] sm:$0xff] (!%p213_p2)  ;;  %vm279_vm1 = vcmask (!%p213_p2), 1039360   ;;  %vm291_vm2 = vcmask (!%p213_p2), 1031168  }
   0x7   : > { %982 = vset.pattern.permute.xlu1 (!%p213_p2), %v1002_v0  ;;  %s1005_s29 = smov (!%p213_p2), 110   ;;  %s1006_s30 = smov (!%p213_p2), 109   ;;  %912 = vmatprep.mubr.msk.bf16.mxu1 (!%p213_p2), %vm392_vm0, %v989_v4  ;;  %vm303_vm3 = vcmask (!%p213_p2), 900096   ;;  %vm315_vm4 = vcmask (!%p213_p2), 891904   ;;  %vm327_vm5 = vcmask (!%p213_p2), 883712   ;;  %vm339_vm6 = vcmask (!%p213_p2), 752640  }
   0x8   : > { %s1007_s7 = smov (!%p213_p2), 108   ;;  %s1008_s8 = smov (!%p213_p2), 92   ;;  %911 = vmatprep.mubr.msk.bf16.mxu0 (!%p213_p2), %vm392_vm0, %v989_v4  ;;  %vm351_vm7 = vcmask (!%p213_p2), 744448   ;;  %vm363_vm8 = vcmask (!%p213_p2), 736256   ;;  %v987_v44 = vld [vmem:[%s1170_s1] ss:$8 sps:$4 sm:$0xff] (!%p213_p2)  }
   0x9   : > { %s1009_s11 = smov (!%p213_p2), 91   ;;  %s1010_s12 = smov (!%p213_p2), 90   ;;  %v481_v49 = vand.u32 (!%p213_p2), 127, %v480_v48 }
   0xb   : > { %v483_v50 = vadd.s32 (!%p213_p2), 256, %v481_v49  ;;  %v482_v51 = vadd.s32 (!%p213_p2), 128, %v481_v49  ;;  %v1090_v54 = vmul.u32.u64.low (!%p213_p2), 3817748708, %v481_v49  ;;  %v1091_v55 = vmul.u32.u64.high 3817748708, %v481_v49, %v1090_v54 }
   0xd   : > { %s1183_s22 = smov (!%p242_p3, %s899_s22), 1  ;;  %v1087_v52 = vmul.u32.u64.low 3817748708, %v483_v50  ;;  %v1088_v53 = vmul.u32.u64.high 3817748708, %v483_v50, %v1087_v52  ;;  %v1093_v56 = vmul.u32.u64.low 3817748708, %v482_v51  ;;  %v1094_v57 = vmul.u32.u64.high 3817748708, %v482_v51, %v1093_v56 }
   0xe   : > { %s957_s23 = smul.u32 24, %s1183_s22  ;;  %v490_v59 = vshrl.u32 %v1091_v55, 4 }
   0xf   : > { %v512_v58 = vshrl.u32 %v1088_v53, 4  ;;  %v501_v60 = vshrl.u32 %v1094_v57, 4 }
  0x10   : > { %s246_s26 = scalar_lea.vmem %s1169_s0, %s957_s23  ;;  %v491_v62 = vmul.u32 18, %v490_v59 }
  0x11   : > { %v983_v1 = vld [vmem:[%s246_s26 + $0x4] ss:$12 sps:$4 sm:$0xff]   ;;  %v985_v2 = vld [vmem:[%s246_s26] ss:$12 sps:$4 sm:$0xff]   ;;  %v986_v3 = vld [vmem:[%s246_s26 + $0x8] ss:$12 sps:$4 sm:$0xff]  }
  0x12   : > { %275 = vrot.lane.b32.xlu0 %v983_v1, %s1003_s27  ;;  %396 = vmatprep.subr.bf16.mxu0 %v983_v1  ;;  %v513_v61 = vmul.u32 18, %v512_v58  ;;  %v502_v63 = vmul.u32 18, %v501_v60 }
  0x13   : > { %273 = vrot.lane.b32.xlu1 %v985_v2, %s1003_s27  ;;  %397 = vmatpush1.bf16.msra.mxu0 %v985_v2 }
  0x14   : > { %440 = vmatpush1.bf16.msra.mxu1 %v986_v3 }
  0x15   : > { %441 = vmatprep.subr.bf16.mxu1 %v1002_v0 }
  0x16   : > { %277 = vrot.lane.b32.xlu0 %v986_v3, %s1003_s27 }
  0x17   : > { %287 = vrot.lane.b32.xlu1 %v983_v1, %s1004_s28 }
  0x1a   : > { %289 = vrot.lane.b32.xlu0 %v986_v3, %s1004_s28 }
  0x1b   : > { %285 = vrot.lane.b32.xlu1 %v985_v2, %s1004_s28 }
  0x1e   : > { %299 = vrot.lane.b32.xlu0 %v983_v1, %s1005_s29 }
  0x1f   : > { %301 = vrot.lane.b32.xlu1 %v986_v3, %s1005_s29 }
  0x22   : > { %297 = vrot.lane.b32.xlu0 %v985_v2, %s1005_s29 }
  0x23   : > { %311 = vrot.lane.b32.xlu1 %v983_v1, %s1006_s30 }
  0x26   : > { %313 = vrot.lane.b32.xlu0 %v986_v3, %s1006_s30 }
  0x27   : > { %309 = vrot.lane.b32.xlu1 %v985_v2, %s1006_s30 }
  0x2a   : > { %323 = vrot.lane.b32.xlu0 %v983_v1, %s1007_s7 }
  0x2b   : > { %325 = vrot.lane.b32.xlu1 %v986_v3, %s1007_s7 }
  0x2e   : > { %321 = vrot.lane.b32.xlu0 %v985_v2, %s1007_s7 }
  0x2f   : > { %335 = vrot.lane.b32.xlu1 %v983_v1, %s1008_s8 }
  0x32   : > { %337 = vrot.lane.b32.xlu0 %v986_v3, %s1008_s8 }
  0x33   : > { %333 = vrot.lane.b32.xlu1 %v985_v2, %s1008_s8 }
  0x36   : > { %347 = vrot.lane.b32.xlu0 %v983_v1, %s1009_s11 }
  0x37   : > { %349 = vrot.lane.b32.xlu1 %v986_v3, %s1009_s11 }
  0x3a   : > { %345 = vrot.lane.b32.xlu0 %v985_v2, %s1009_s11 }
  0x3b   : > { %359 = vrot.lane.b32.xlu1 %v983_v1, %s1010_s12  ;;  %v492_v1 = vsub.s32 %v481_v49, %v491_v62 }
  0x3d   : > { %vm517_vm11 = vcmp.ne.s32.totalorder %v492_v1, 0  ;;  %vm520_vm12 = vcmp.lt.s32.totalorder %v492_v1, 0  ;;  %v526_v4 = vadd.s32 18, %v492_v1 }
  0x3e   : > { %361 = vrot.lane.b32.xlu0 %v986_v3, %s1010_s12 }
  0x3f   : > { %357 = vrot.lane.b32.xlu1 %v985_v2, %s1010_s12  ;;  %v503_v2 = vsub.s32 %v482_v51, %v502_v63  ;;  %s251_s12 = scalar_lea.vmem %s1175_s6, %s957_s23 }
  0x41   : > { %vm518_vm13 = vcmp.ne.s32.totalorder %v503_v2, 0  ;;  %vm521_vm14 = vcmp.lt.s32.totalorder %v503_v2, 0 }
  0x42   : > { %375 = vperm.xlu0 %981, %v371_v5   ;;  %v527_v5 = vadd.s32 18, %v503_v2 }
  0x43   : > { %380 = vperm.xlu1 %982, %v372_v6  }
  0x84   : > { %v276_v7 = vpop.permute.xlu0 %275 }
  0x85   : > { %v274_v8 = vpop.permute.xlu1 %273 }
  0x86   : > { %v280_v12 = vsel %vm279_vm1, %v274_v8, %v276_v7 }
  0x88   : > { %v278_v9 = vpop.permute.xlu0 %277 }
  0x89   : > { %v288_v10 = vpop.permute.xlu1 %287  ;;  %442 = vmatpush1.bf16.msra.mxu1 %v278_v9  ;;  %v281_v11 = vsel %vm279_vm1, %v276_v7, %v278_v9  ;;  %vm523_vm1 = vmand %vm520_vm12, %vm517_vm11  ;;  %vm840_vm12 = vcmask 257024  }
  0x8a   : > { %398 = vmatprep.subr.bf16.mxu0 %v281_v11  ;;  %443 = vmatprep.subr.bf16.mxu1 %v1002_v0  ;;  %v529_v8 = vsel %vm523_vm1, %v526_v4, %v492_v1 }
  0x8b   : > { %399 = vmatpush1.bf16.msra.mxu0 %v280_v12 }
  0x8c   : > { %v290_v13 = vpop.permute.xlu0 %289 }
  0x8d   : > { %v286_v14 = vpop.permute.xlu1 %285  ;;  %444 = vmatpush1.bf16.msra.mxu1 %v290_v13  ;;  %v293_v15 = vsel %vm291_vm2, %v288_v10, %v290_v13 }
  0x8e   : > { %400 = vmatprep.subr.bf16.mxu0 %v293_v15  ;;  %v292_v16 = vsel %vm291_vm2, %v286_v14, %v288_v10  ;;  %445 = vmatprep.subr.bf16.mxu1 %v1002_v0  ;;  %vm524_vm2 = vmand %vm521_vm14, %vm518_vm13 }
  0x8f   : > { %401 = vmatpush1.bf16.msra.mxu0 %v292_v16  ;;  %v530_v9 = vsel %vm524_vm2, %v527_v5, %v503_v2 }
  0x90   : > { %v300_v17 = vpop.permute.xlu0 %299 }
  0x91   : > { %v302_v18 = vpop.permute.xlu1 %301 }
  0x92   : > { %v305_v19 = vsel %vm303_vm3, %v300_v17, %v302_v18  ;;  %446 = vmatpush1.bf16.msra.mxu1 %v302_v18 }
  0x93   : > { %402 = vmatprep.subr.bf16.mxu0 %v305_v19  ;;  %447 = vmatprep.subr.bf16.mxu1 %v1002_v0 }
  0x94   : > { %v298_v20 = vpop.permute.xlu0 %297 }
  0x95   : > { %v312_v21 = vpop.permute.xlu1 %311  ;;  %v304_v22 = vsel %vm303_vm3, %v298_v20, %v300_v17 }
  0x96   : > { %403 = vmatpush1.bf16.msra.mxu0 %v304_v22 }
  0x98   : > { %v314_v23 = vpop.permute.xlu0 %313 }
  0x99   : > { %v310_v24 = vpop.permute.xlu1 %309  ;;  %448 = vmatpush1.bf16.msra.mxu1 %v314_v23  ;;  %v317_v25 = vsel %vm315_vm4, %v312_v21, %v314_v23 }
  0x9a   : > { %404 = vmatprep.subr.bf16.mxu0 %v317_v25  ;;  %v316_v26 = vsel %vm315_vm4, %v310_v24, %v312_v21  ;;  %449 = vmatprep.subr.bf16.mxu1 %v1002_v0  ;;  %vm1103_vm4 = vcmp.lt.s32.totalorder %v529_v8, 16 }
  0x9b   : > { %405 = vmatpush1.bf16.msra.mxu0 %v316_v26 }
  0x9c   : > { %v324_v27 = vpop.permute.xlu0 %323 }
  0x9d   : > { %v326_v28 = vpop.permute.xlu1 %325 }
  0x9e   : > { %v329_v29 = vsel %vm327_vm5, %v324_v27, %v326_v28  ;;  %450 = vmatpush1.bf16.msra.mxu1 %v326_v28 }
  0x9f   : > { %406 = vmatprep.subr.bf16.mxu0 %v329_v29  ;;  %451 = vmatprep.subr.bf16.mxu1 %v1002_v0 }
  0xa0   : > { %v322_v30 = vpop.permute.xlu0 %321 }
  0xa1   : > { %v336_v31 = vpop.permute.xlu1 %335  ;;  %v328_v32 = vsel %vm327_vm5, %v322_v30, %v324_v27  ;;  %vm1107_vm5 = vcmp.lt.s32.totalorder %v530_v9, 16 }
  0xa2   : > { %407 = vmatpush1.bf16.msra.mxu0 %v328_v32 }
  0xa4   : > { %v338_v33 = vpop.permute.xlu0 %337 }
  0xa5   : > { %v334_v34 = vpop.permute.xlu1 %333  ;;  %452 = vmatpush1.bf16.msra.mxu1 %v338_v33  ;;  %v341_v35 = vsel %vm339_vm6, %v336_v31, %v338_v33 }
  0xa6   : > { %408 = vmatprep.subr.bf16.mxu0 %v341_v35  ;;  %v340_v36 = vsel %vm339_vm6, %v334_v34, %v336_v31  ;;  %453 = vmatprep.subr.bf16.mxu1 %v1002_v0  ;;  %vm548_vm6 = vcmask 261120  }
  0xa7   : > { %409 = vmatpush1.bf16.msra.mxu0 %v340_v36 }
  0xa8   : > { %v348_v37 = vpop.permute.xlu0 %347 }
  0xa9   : > { %v350_v38 = vpop.permute.xlu1 %349 }
  0xaa   : > { %v353_v39 = vsel %vm351_vm7, %v348_v37, %v350_v38  ;;  %454 = vmatpush1.bf16.msra.mxu1 %v350_v38 }
  0xab   : > { %410 = vmatprep.subr.bf16.mxu0 %v353_v39  ;;  %455 = vmatprep.subr.bf16.mxu1 %v1002_v0  ;;  %v514_v0 = vsub.s32 %v483_v50, %v513_v61 }
  0xac   : > { %v346_v40 = vpop.permute.xlu0 %345 }
  0xad   : > { %v360_v41 = vpop.permute.xlu1 %359  ;;  %v352_v42 = vsel %vm351_vm7, %v346_v40, %v348_v37  ;;  %vm519_vm9 = vcmp.ne.s32.totalorder %v514_v0, 0  ;;  %vm522_vm10 = vcmp.lt.s32.totalorder %v514_v0, 0  ;;  %v528_v3 = vadd.s32 18, %v514_v0  ;;  %v558_v40 = vld [vmem:[%s1172_s3] sm:$0xff] }
  0xae   : > { %411 = vmatpush1.bf16.msra.mxu0 %v352_v42  ;;  %vm525_vm15 = vmand %vm522_vm10, %vm519_vm9 }
  0xaf   : > { %v531_v6 = vsel %vm525_vm15, %v528_v3, %v514_v0 }
  0xb0   : > { %v362_v43 = vpop.permute.xlu0 %361  ;;  %vm1099_vm3 = vcmp.lt.s32.totalorder %v531_v6, 16 }
  0xb1   : > { %v358_v45 = vpop.permute.xlu1 %357  ;;  %456 = vmatpush1.bf16.msra.mxu1 %v362_v43  ;;  %v365_v46 = vsel %vm363_vm8, %v360_v41, %v362_v43 }
  0xb2   : > { %412 = vmatprep.subr.bf16.mxu0 %v365_v46  ;;  %v364_v47 = vsel %vm363_vm8, %v358_v45, %v360_v41 }
  0xb3   : > { %413 = vmatpush1.bf16.msra.mxu0 %v364_v47 }
  0xb4   : > { %472 = vmatmul.mubr.bf16.vlgmr.msra.gmra.mrb[0].mxu1 %v987_v44 }
  0xb5   : > { %946 = vmatprep.mubr.msk.f32.mxu1 %vm392_vm0, %v558_v40 }
  0xb6   : > { %429 = vmatmul.mubr.bf16.vlgmr.msra.gmra.mrb[0].mxu0 %v987_v44  ;;  %v559_v44 = vld [vmem:[%s1172_s3 + $0x8] sm:$0xff] }
  0xb7   : > { %939 = vmatprep.mubr.msk.f32.mxu0 %vm392_vm0, %v558_v40 }
  0xc1   : > { %v376_v7 = vpop.permute.xlu0 %375 }
  0xc2   : > { %v381_v11 = vpop.permute.xlu1 %380 }
 0x187   : > { %v473_v10 = vpop.f32.mrb[0].mxu1 }
 0x188   : > { %v474_v13 = vadd.f32 %v473_v10, %v376_v7  ;;  %v475_v14 = vpop.f32.mrb[1].mxu1 }
 0x189   : > { %v430_v15 = vpop.f32.mrb[0].mxu0  ;;  %v476_v18 = vpop.f32.mrb[2].mxu1 }
 0x18a   : > { %v431_v19 = vadd.f32 %v430_v15, %v376_v7  ;;  %v432_v20 = vpop.f32.mrb[1].mxu0  ;;  %v478_v21 = vpop.f32.mrb[3].mxu1  ;;  %v477_v22 = vadd.f32 %v476_v18, %v381_v11  ;;  %v543_v23 = vsel %vm1099_vm3, %v474_v13, 0.0 }
 0x18b   : > { %v433_v24 = vadd.f32 %v432_v20, %v376_v7  ;;  %v434_v25 = vpop.f32.mrb[2].mxu0  ;;  %v549_v31 = vsel %vm548_vm6, %v543_v23, 0.0  ;;  %v764_v20 = vld [vmem:[%s1173_s4 + $0x8] sm:$0xff]  ;;  %v763_v21 = vld [vmem:[%s1173_s4] sm:$0xff] }
 0x18c   : > { %v541_v26 = vsel %vm1103_vm4, %v431_v19, 0.0  ;;  %v435_v27 = vadd.f32 %v434_v25, %v381_v11  ;;  %v436_v28 = vpop.f32.mrb[3].mxu0  ;;  %v546_v34 = vsel %vm1099_vm3, %v477_v22, 0.0 }
 0x18d   : > { %v542_v29 = vsel %vm1107_vm5, %v433_v24, 0.0  ;;  %v437_v30 = vadd.f32 %v436_v28, %v381_v11  ;;  %v554_v38 = vsel %vm548_vm6, %v546_v34, 0.0 }
 0x18e   : > { %v544_v32 = vsel %vm1103_vm4, %v435_v27, 0.0  ;;  %v547_v33 = vadd.f32 %v542_v29, %v541_v26  ;;  %v783_v26 = vld [vmem:[%s1174_s5] sm:$0xff] }
 0x18f   : > { %v545_v35 = vsel %vm1107_vm5, %v437_v30, 0.0 }
 0x190   : > { %v550_v36 = vadd.f32 %v549_v31, %v547_v33  ;;  %v553_v37 = vadd.f32 %v545_v35, %v544_v32 }
 0x192   : > { %551 = vadd.xlane.f32.xlu1 %v550_v36  ;;  %v555_v39 = vadd.f32 %v554_v38, %v553_v37 }
 0x194   : > { %556 = vadd.xlane.f32.xlu0 %v555_v39 }
 0x21f   : > { %v552_v41 = vpop.xlane.xlu1 %551 }
 0x221   : > { %v557_v42 = vpop.xlane.xlu0 %556 }
 0x222   : > { %v949_v43 = vpack.c.bf16 %v557_v42, %v552_v41 }
 0x224   : > { %950 = vmatprep.subr.bf16.mxu0 %v949_v43 }
 0x225   : > { %952 = vmatpush3.bf16.msra.mxu0 %v949_v43 }
 0x228   : > { %940 = vmatmul.mubr.msk.f32.vlgmr.msra.gmra.mrb[4].mxu0 %vm392_vm0, %v559_v44 }
 0x2fb   : > { %v941_v45 = vpop.f32.mrb[4].mxu0 }
 0x2fc   : > { %v643_v46 = vmul.f32 0.00390625, %v941_v45  ;;  %v632_v47 = vpop.f32.mrb[5].mxu0 }
 0x2fd   : > { %v642_v48 = vmul.f32 0.00390625, %v632_v47 }
 0x2fe   : > { %651 = vperm.xlu1 %982, %v643_v46  }
 0x2ff   : > { %646 = vperm.xlu0 %981, %v642_v48  }
 0x37d   : > { %v652_v49 = vpop.permute.xlu1 %651 }
 0x37e   : > { %v657_v50 = vsub.f32 %v435_v27, %v652_v49  ;;  %v658_v51 = vsub.f32 %v437_v30, %v652_v49  ;;  %v659_v52 = vsub.f32 %v477_v22, %v652_v49  ;;  %v647_v53 = vpop.permute.xlu0 %646  ;;  %v784_v27 = vld [vmem:[%s1174_s5 + $0x8] sm:$0xff] }
 0x37f   : > { %v654_v54 = vsub.f32 %v431_v19, %v647_v53  ;;  %v655_v55 = vsub.f32 %v433_v24, %v647_v53  ;;  %v656_v56 = vsub.f32 %v474_v13, %v647_v53 }
 0x380   : > { %v663_v57 = vsel %vm1103_vm4, %v657_v50, 0.0  ;;  %v664_v58 = vsel %vm1107_vm5, %v658_v51, 0.0  ;;  %v665_v59 = vsel %vm1099_vm3, %v659_v52, 0.0 }
 0x381   : > { %v660_v60 = vsel %vm1103_vm4, %v654_v54, 0.0  ;;  %v661_v61 = vsel %vm1107_vm5, %v655_v55, 0.0  ;;  %v669_v62 = vmul.f32 %v663_v57, %v663_v57  ;;  %v670_v63 = vmul.f32 %v664_v58, %v664_v58 }
 0x382   : > { %v671_v0 = vmul.f32 %v665_v59, %v665_v59  ;;  %v662_v1 = vsel %vm1099_vm3, %v656_v56, 0.0  ;;  %v666_v2 = vmul.f32 %v660_v60, %v660_v60  ;;  %v667_v3 = vmul.f32 %v661_v61, %v661_v61 }
 0x383   : > { %v677_v4 = vadd.f32 %v670_v63, %v669_v62  ;;  %v668_v5 = vmul.f32 %v662_v1, %v662_v1 }
 0x384   : > { %v678_v6 = vsel %vm548_vm6, %v671_v0, 0.0  ;;  %v672_v7 = vadd.f32 %v667_v3, %v666_v2 }
 0x385   : > { %v679_v8 = vadd.f32 %v678_v6, %v677_v4  ;;  %v673_v9 = vsel %vm548_vm6, %v668_v5, 0.0 }
 0x386   : > { %v674_v10 = vadd.f32 %v673_v9, %v672_v7 }
 0x387   : > { %680 = vadd.xlane.f32.xlu0 %v679_v8 }
 0x388   : > { %675 = vadd.xlane.f32.xlu1 %v674_v10 }
 0x414   : > { %v681_v11 = vpop.xlane.xlu0 %680 }
 0x415   : > { %v676_v13 = vpop.xlane.xlu1 %675 }
 0x416   : > { %v953_v14 = vpack.c.bf16 %v681_v11, %v676_v13 }
 0x418   : > { %954 = vmatprep.subr.bf16.mxu1 %v953_v14 }
 0x419   : > { %956 = vmatpush3.bf16.msra.mxu1 %v953_v14 }
 0x41c   : > { %947 = vmatmul.mubr.msk.f32.vlgmr.msra.gmra.mrb[4].mxu1 %vm392_vm0, %v559_v44 }
 0x4ef   : > { %v948_v12 = vpop.f32.mrb[4].mxu1 }
 0x4f0   : > { %v758_v15 = vmul.f32 0.00390625, %v948_v12  ;;  %v748_v16 = vpop.f32.mrb[5].mxu1 }
 0x4f1   : > { %v757_v17 = vmul.f32 0.00390625, %v748_v16 }
 0x4f2   : > { %v760_v18 = vadd.f32 1e-05, %v758_v15 }
 0x4f3   : > { %v759_v19 = vadd.f32 1e-05, %v757_v17 }
 0x4f4   : > { %990 = vrsqrt.f32 %v760_v18 }
 0x4f5   : > { %992 = vrsqrt.f32 %v759_v19 }
 0x4fe   : > { %v991_v22 = vpop.eup %990 }
 0x4ff   : > { %v993_v23 = vpop.eup %992  ;;  %v766_v24 = vmul.f32 %v991_v22, %v764_v20 }
 0x500   : > { %v765_v25 = vmul.f32 %v993_v23, %v763_v21 }
 0x501   : > { %774 = vperm.xlu1 %982, %v766_v24  }
 0x502   : > { %769 = vperm.xlu0 %981, %v765_v25  }
 0x505   : > { %787 = vperm.xlu1 %982, %v783_v26  }
 0x506   : > { %792 = vperm.xlu0 %981, %v784_v27  }
 0x580   : > { %v775_v28 = vpop.permute.xlu1 %774 }
 0x581   : > { %v770_v29 = vpop.permute.xlu0 %769  ;;  %v780_v33 = vmul.f32 %v775_v28, %v657_v50  ;;  %v781_v34 = vmul.f32 %v775_v28, %v658_v51  ;;  %v782_v35 = vmul.f32 %v775_v28, %v659_v52 }
 0x582   : > { %v777_v30 = vmul.f32 %v770_v29, %v654_v54  ;;  %v778_v31 = vmul.f32 %v770_v29, %v655_v55  ;;  %v779_v32 = vmul.f32 %v770_v29, %v656_v56 }
 0x584   : > { %v788_v36 = vpop.permute.xlu1 %787 }
 0x585   : > { %v795_v37 = vadd.f32 %v788_v36, %v777_v30  ;;  %v796_v38 = vadd.f32 %v788_v36, %v778_v31  ;;  %v797_v39 = vadd.f32 %v788_v36, %v779_v32  ;;  %v793_v40 = vpop.permute.xlu0 %792 }
 0x586   : > { %v798_v41 = vadd.f32 %v793_v40, %v780_v33  ;;  %v799_v42 = vadd.f32 %v793_v40, %v781_v34  ;;  %v800_v43 = vadd.f32 %v793_v40, %v782_v35 }
 0x587   : > { %vm801_vm0 = vcmp.gt.f32.partialorder %v795_v37, 0.0  ;;  %vm802_vm7 = vcmp.gt.f32.partialorder %v796_v38, 0.0  ;;  %vm803_vm8 = vcmp.gt.f32.partialorder %v797_v39, 0.0  ;;  %v807_v44 = vmul.f32 0.2, %v795_v37 }
 0x588   : > { %v808_v45 = vmul.f32 0.2, %v796_v38  ;;  %v809_v46 = vmul.f32 0.2, %v797_v39  ;;  %vm804_vm9 = vcmp.gt.f32.partialorder %v798_v41, 0.0  ;;  %vm805_vm10 = vcmp.gt.f32.partialorder %v799_v42, 0.0 }
 0x589   : > { %v813_v47 = vsel %vm801_vm0, %v795_v37, %v807_v44  ;;  %vm806_vm11 = vcmp.gt.f32.partialorder %v800_v43, 0.0  ;;  %v810_v48 = vmul.f32 0.2, %v798_v41  ;;  %v811_v49 = vmul.f32 0.2, %v799_v42 }
 0x58a   : > { %v814_v50 = vsel %vm802_vm7, %v796_v38, %v808_v45  ;;  %v815_v51 = vsel %vm803_vm8, %v797_v39, %v809_v46  ;;  %v812_v52 = vmul.f32 0.2, %v800_v43 }
 0x58b   : > { %v923_v53 = vpack.c.bf16 %v814_v50, %v813_v47  ;;  %v924_v54 = vpack.c.bf16 %v815_v51, %v815_v51  ;;  %v816_v55 = vsel %vm804_vm9, %v798_v41, %v810_v48  ;;  %v817_v56 = vsel %vm805_vm10, %v799_v42, %v811_v49 }
 0x58c   : > { %v818_v57 = vsel %vm806_vm11, %v800_v43, %v812_v52  ;;  %v925_v58 = vpack.c.bf16 %v817_v56, %v816_v55 }
 0x58d   : > { %839 = vst [vmem:[%s251_s12] sm:$0xff] %v923_v53  ;;  %841 = vst.msk [vmem:[%s251_s12 + $0x8] sm:$0xf] %vm840_vm12, %v924_v54  ;;  %v926_v59 = vpack.c.bf16 %v818_v57, %v818_v57 }
 0x58e   : > { %842 = vst [vmem:[%s251_s12 + $0xc] sm:$0xff] %v925_v58 }
 0x58f   : > { %843 = vst.msk [vmem:[%s251_s12 + $0x14] sm:$0xf] %vm840_vm12, %v926_v59 }
 0x590 PF: > { %s16_s21 = sadd.s32 1, %s1000_s21  }
 0x591   : > { %p13_p4 = scmp.ge.s32.totalorder %s16_s21, 4  }
 0x593   :  { %15 = sbr.rel (!%p13_p4) target bundleno = 1 (0x1), region = 74 }

// kernel: dcgan64_decoder_forward.3
= control target key start
LH: loop header
LB: loop body
LE: loop exit
PB: predicated region body
PF: predicated region fallthrough
CT: control target
= control target key end

     0   :  { %s1301_s21 = smov 0   ;;  %s1546_s0 = inlined_call_operand.vmem [shape: bf16[2,32,342], index: 0, kind: input, shape index: {}]   ;;  %s1547_s1 = inlined_call_operand.vmem [shape: bf16[16,288], index: 1, kind: input, shape index: {}]   ;;  %s1548_s2 = inlined_call_operand.vmem [shape: f32[16,1], index: 2, kind: input, shape index: {}]   ;;  %s1549_s3 = inlined_call_operand.vmem [shape: f32[16,16], index: 3, kind: input, shape index: {}]   ;;  %s1550_s4 = inlined_call_operand.vmem [shape: f32[16,1], index: 4, kind: input, shape index: {}]   ;;  %s1551_s5 = inlined_call_operand.vmem [shape: f32[16,1], index: 5, kind: input, shape index: {}]   ;;  %s1552_s6 = inlined_call_operand.vmem [shape: bf16[2,16,288], index: 6, kind: output, shape index: {}]  }
   0x1 LB: > { %s1099_s22 = sadd.s32 4294967295, %s1253_s21   ;;  %p1103_p0 = scmp.ge.s32.totalorder %s1253_s21, 1  ;;  %s1253_s21 = sphi %s1301_s21, %s16_s21  }
   0x2   : > { %p212_p1 = scmp.lt.s32.totalorder %s1253_s21, 3 }
   0x4   : > { %p213_p2 = pnand %p1103_p0, %p212_p1 }
   0x5   : > { %p242_p3 = scmp.lt.s32.totalorder (!%p213_p2), %s1099_s22, 1  ;;  %s1255_s27 = smov (!%p213_p2), 127   ;;  %v1259_v6 = vmov (!%p213_p2), 0   ;;  %v1356_v7 = vld [vmem:[%s1547_s1 + $0x4] ss:$12 sps:$4 sm:$0xff] (!%p213_p2)   ;;  %v482_v9 = vld [vmem:[%s1548_s2 + $0x8] sm:$0xff] (!%p213_p2) }
   0x6   : > { %216 = sbr.rel (%p213_p2) target bundleno = 1474 (0x5c2), region = 44  ;;  %s1256_s28 = smov (!%p213_p2), 126   ;;  %587 = vmatprep.mubr.bf16.mxu1 (!%p213_p2), %v1259_v6  ;;  %1229 = vset.pattern.permute.xlu0 (!%p213_p2), %v1259_v6  ;;  %v481_v8 = vld [vmem:[%s1548_s2] sm:$0xff] (!%p213_p2)  ;;  %vm305_vm0 = vcmask (!%p213_p2), 1039360   ;;  %vm328_vm1 = vcmask (!%p213_p2), 1031168   ;;  %vm466_vm2 = vcmask (!%p213_p2), 736256  }
   0x7   : > { %s1257_s29 = smov (!%p213_p2), 90   ;;  %s1258_s30 = smov (!%p213_p2), 110   ;;  %1230 = vset.pattern.permute.xlu1 (!%p213_p2), %v1259_v6  ;;  %544 = vmatprep.mubr.bf16.mxu0 (!%p213_p2), %v1356_v7  ;;  %vm351_vm3 = vcmask (!%p213_p2), 900096   ;;  %v1403_v46 = vld [vmem:[%s1547_s1 + $0x8] ss:$12 sps:$4 sm:$0xff] (!%p213_p2)   ;;  %vm508_vm4 = vcmask (!%p213_p2), 261120  }
   0x8   : > { %s1260_s7 = smov (!%p213_p2), 109   ;;  %s1261_s8 = smov (!%p213_p2), 108   ;;  %vm374_vm5 = vcmask (!%p213_p2), 891904   ;;  %vm397_vm6 = vcmask (!%p213_p2), 883712   ;;  %vm420_vm7 = vcmask (!%p213_p2), 752640   ;;  %vm443_vm8 = vcmask (!%p213_p2), 744448  }
   0x9   : > { %s1262_s9 = smov (!%p213_p2), 92   ;;  %s1263_s12 = smov (!%p213_p2), 91   ;;  %vm1265_vm9 = vmmov (!%p213_p2), 0  }
   0xd   : > { %s1566_s22 = smov (!%p242_p3, %s1099_s22), 1 }
   0xe   : > { %s1202_s23 = smul.u32 48, %s1566_s22 }
   0xf   : > { %s1203_s11 = smul.u32 24, %s1566_s22 }
  0x10   : > { %s246_s26 = scalar_lea.vmem %s1546_s0, %s1202_s23 }
  0x11   : > { %v1315_v0 = vld [vmem:[%s246_s26 + $0x4] ss:$12 sps:$4 sm:$0xff]   ;;  %v1317_v1 = vld [vmem:[%s246_s26] ss:$12 sps:$4 sm:$0xff]   ;;  %v1320_v2 = vld [vmem:[%s246_s26 + $0x8] ss:$12 sps:$4 sm:$0xff]   ;;  %s251_s14 = scalar_lea.vmem %s1552_s6, %s1203_s11 }
  0x12   : > { %295 = vrot.lane.b32.xlu0 %v1315_v0, %s1255_s27  ;;  %512 = vmatprep.subr.bf16.mxu0 %v1315_v0  ;;  %v1235_v3 = vld [vmem:[%s246_s26 + $0x1c] ss:$12 sps:$4 sm:$0xff]   ;;  %v1238_v4 = vld [vmem:[%s246_s26 + $0x18] ss:$12 sps:$4 sm:$0xff]   ;;  %v1326_v5 = vld [vmem:[%s246_s26 + $0x20] ss:$12 sps:$4 sm:$0xff]  }
  0x13   : > { %293 = vrot.lane.b32.xlu1 %v1317_v1, %s1255_s27  ;;  %513 = vmatpush1.bf16.msra.mxu0 %v1317_v1 }
  0x14   : > { %514 = vmatprep.subr.bf16.mxu0 %v1235_v3 }
  0x16   : > { %297 = vrot.lane.b32.xlu0 %v1320_v2, %s1255_s27 }
  0x17   : > { %301 = vrot.lane.b32.xlu1 %v1235_v3, %s1255_s27  ;;  %515 = vmatpush1.bf16.msra.mxu0 %v1238_v4 }
  0x1a   : > { %303 = vrot.lane.b32.xlu0 %v1326_v5, %s1255_s27 }
  0x1b   : > { %299 = vrot.lane.b32.xlu1 %v1238_v4, %s1255_s27 }
  0x1e   : > { %318 = vrot.lane.b32.xlu0 %v1315_v0, %s1256_s28 }
  0x1f   : > { %320 = vrot.lane.b32.xlu1 %v1320_v2, %s1256_s28 }
  0x22   : > { %316 = vrot.lane.b32.xlu0 %v1317_v1, %s1256_s28 }
  0x23   : > { %324 = vrot.lane.b32.xlu1 %v1235_v3, %s1256_s28 }
  0x26   : > { %326 = vrot.lane.b32.xlu0 %v1326_v5, %s1256_s28 }
  0x27   : > { %456 = vrot.lane.b32.xlu1 %v1315_v0, %s1257_s29 }
  0x2a   : > { %458 = vrot.lane.b32.xlu0 %v1320_v2, %s1257_s29 }
  0x2b   : > { %322 = vrot.lane.b32.xlu1 %v1238_v4, %s1256_s28 }
  0x2e   : > { %454 = vrot.lane.b32.xlu0 %v1317_v1, %s1257_s29 }
  0x2f   : > { %341 = vrot.lane.b32.xlu1 %v1315_v0, %s1258_s30 }
  0x32   : > { %343 = vrot.lane.b32.xlu0 %v1320_v2, %s1258_s30 }
  0x33   : > { %462 = vrot.lane.b32.xlu1 %v1235_v3, %s1257_s29 }
  0x36   : > { %464 = vrot.lane.b32.xlu0 %v1326_v5, %s1257_s29 }
  0x37   : > { %339 = vrot.lane.b32.xlu1 %v1317_v1, %s1258_s30 }
  0x3a   : > { %460 = vrot.lane.b32.xlu0 %v1238_v4, %s1257_s29 }
  0x3b   : > { %347 = vrot.lane.b32.xlu1 %v1235_v3, %s1258_s30 }
  0x3e   : > { %349 = vrot.lane.b32.xlu0 %v1326_v5, %s1258_s30 }
  0x3f   : > { %345 = vrot.lane.b32.xlu1 %v1238_v4, %s1258_s30 }
  0x42   : > { %366 = vrot.lane.b32.xlu0 %v1320_v2, %s1260_s7 }
  0x43   : > { %364 = vrot.lane.b32.xlu1 %v1315_v0, %s1260_s7 }
  0x46   : > { %362 = vrot.lane.b32.xlu0 %v1317_v1, %s1260_s7 }
  0x47   : > { %372 = vrot.lane.b32.xlu1 %v1326_v5, %s1260_s7 }
  0x4a   : > { %370 = vrot.lane.b32.xlu0 %v1235_v3, %s1260_s7 }
  0x4b   : > { %368 = vrot.lane.b32.xlu1 %v1238_v4, %s1260_s7 }
  0x4e   : > { %389 = vrot.lane.b32.xlu0 %v1320_v2, %s1261_s8 }
  0x4f   : > { %387 = vrot.lane.b32.xlu1 %v1315_v0, %s1261_s8 }
  0x52   : > { %385 = vrot.lane.b32.xlu0 %v1317_v1, %s1261_s8 }
  0x53   : > { %395 = vrot.lane.b32.xlu1 %v1326_v5, %s1261_s8 }
  0x56   : > { %393 = vrot.lane.b32.xlu0 %v1235_v3, %s1261_s8 }
  0x57   : > { %391 = vrot.lane.b32.xlu1 %v1238_v4, %s1261_s8 }
  0x5a   : > { %412 = vrot.lane.b32.xlu0 %v1320_v2, %s1262_s9 }
  0x5b   : > { %410 = vrot.lane.b32.xlu1 %v1315_v0, %s1262_s9 }
  0x5e   : > { %408 = vrot.lane.b32.xlu0 %v1317_v1, %s1262_s9 }
  0x5f   : > { %418 = vrot.lane.b32.xlu1 %v1326_v5, %s1262_s9 }
  0x62   : > { %416 = vrot.lane.b32.xlu0 %v1235_v3, %s1262_s9 }
  0x63   : > { %414 = vrot.lane.b32.xlu1 %v1238_v4, %s1262_s9 }
  0x66   : > { %435 = vrot.lane.b32.xlu0 %v1320_v2, %s1263_s12 }
  0x67   : > { %433 = vrot.lane.b32.xlu1 %v1315_v0, %s1263_s12 }
  0x6a   : > { %431 = vrot.lane.b32.xlu0 %v1317_v1, %s1263_s12 }
  0x6b   : > { %441 = vrot.lane.b32.xlu1 %v1326_v5, %s1263_s12 }
  0x6e   : > { %439 = vrot.lane.b32.xlu0 %v1235_v3, %s1263_s12 }
  0x6f   : > { %437 = vrot.lane.b32.xlu1 %v1238_v4, %s1263_s12 }
  0x72   : > { %485 = vperm.xlu0 %1229, %v481_v8  }
  0x73   : > { %490 = vperm.xlu1 %1230, %v482_v9  }
  0x84   : > { %v296_v10 = vpop.permute.xlu0 %295 }
  0x85   : > { %v294_v11 = vpop.permute.xlu1 %293 }
  0x86   : > { %v306_v15 = vsel %vm305_vm0, %v294_v11, %v296_v10 }
  0x88   : > { %v1369_v12 = vpop.permute.xlu0 %297 }
  0x89   : > { %v302_v13 = vpop.permute.xlu1 %301  ;;  %v307_v14 = vsel %vm305_vm0, %v296_v10, %v1369_v12 }
  0x8a   : > { %516 = vmatprep.subr.bf16.mxu0 %v307_v14 }
  0x8b   : > { %517 = vmatpush1.bf16.msra.mxu0 %v306_v15 }
  0x8c   : > { %v1372_v16 = vpop.permute.xlu0 %303 }
  0x8d   : > { %v300_v17 = vpop.permute.xlu1 %299  ;;  %v309_v18 = vsel %vm305_vm0, %v302_v13, %v1372_v16 }
  0x8e   : > { %518 = vmatprep.subr.bf16.mxu0 %v309_v18  ;;  %v308_v19 = vsel %vm305_vm0, %v300_v17, %v302_v13 }
  0x8f   : > { %519 = vmatpush1.bf16.msra.mxu0 %v308_v19 }
  0x90   : > { %v319_v20 = vpop.permute.xlu0 %318 }
  0x91   : > { %v1375_v21 = vpop.permute.xlu1 %320 }
  0x92   : > { %v330_v22 = vsel %vm328_vm1, %v319_v20, %v1375_v21 }
  0x93   : > { %520 = vmatprep.subr.bf16.mxu0 %v330_v22 }
  0x94   : > { %v317_v23 = vpop.permute.xlu0 %316 }
  0x95   : > { %v325_v24 = vpop.permute.xlu1 %324  ;;  %v329_v25 = vsel %vm328_vm1, %v317_v23, %v319_v20  ;;  %v1240_v23 = vld [vmem:[%s1547_s1] ss:$12 sps:$4 sm:$0xff]  }
  0x96   : > { %521 = vmatpush1.bf16.msra.mxu0 %v329_v25  ;;  %v1264_v25 = vmov 0.0  }
  0x98   : > { %v1380_v26 = vpop.permute.xlu0 %326 }
  0x99   : > { %v457_v27 = vpop.permute.xlu1 %456  ;;  %v332_v28 = vsel %vm328_vm1, %v325_v24, %v1380_v26 }
  0x9a   : > { %522 = vmatprep.subr.bf16.mxu0 %v332_v28 }
  0x9c   : > { %v1384_v29 = vpop.permute.xlu0 %458 }
  0x9d   : > { %v323_v30 = vpop.permute.xlu1 %322  ;;  %v468_v31 = vsel %vm466_vm2, %v457_v27, %v1384_v29 }
  0x9e   : > { %v331_v32 = vsel %vm328_vm1, %v323_v30, %v325_v24  ;;  %555 = vmatprep.subr.bf16.mxu1 %v468_v31 }
  0x9f   : > { %523 = vmatpush1.bf16.msra.mxu0 %v331_v32 }
  0xa0   : > { %v455_v33 = vpop.permute.xlu0 %454 }
  0xa1   : > { %v342_v34 = vpop.permute.xlu1 %341  ;;  %v467_v35 = vsel %vm466_vm2, %v455_v33, %v457_v27 }
  0xa2   : > { %556 = vmatpush1.bf16.msra.mxu1 %v467_v35 }
  0xa4   : > { %v1390_v36 = vpop.permute.xlu0 %343 }
  0xa5   : > { %v463_v37 = vpop.permute.xlu1 %462  ;;  %v353_v38 = vsel %vm351_vm3, %v342_v34, %v1390_v36 }
  0xa6   : > { %524 = vmatprep.subr.bf16.mxu0 %v353_v38 }
  0xa8   : > { %v1394_v39 = vpop.permute.xlu0 %464 }
  0xa9   : > { %v340_v40 = vpop.permute.xlu1 %339  ;;  %v470_v41 = vsel %vm466_vm2, %v463_v37, %v1394_v39 }
  0xaa   : > { %v352_v42 = vsel %vm351_vm3, %v340_v40, %v342_v34  ;;  %557 = vmatprep.subr.bf16.mxu1 %v470_v41  ;;  %v680_v34 = vlaneseq }
  0xab   : > { %525 = vmatpush1.bf16.msra.mxu0 %v352_v42 }
  0xac   : > { %v461_v43 = vpop.permute.xlu0 %460  ;;  %v681_v35 = vand.u32 127, %v680_v34 }
  0xad   : > { %v348_v44 = vpop.permute.xlu1 %347  ;;  %v469_v45 = vsel %vm466_vm2, %v461_v43, %v463_v37 }
  0xae   : > { %558 = vmatpush1.bf16.msra.mxu1 %v469_v45  ;;  %v683_v37 = vadd.s32 256, %v681_v35 }
  0xb0   : > { %v1405_v47 = vpop.permute.xlu0 %349 }
  0xb1   : > { %v346_v48 = vpop.permute.xlu1 %345  ;;  %v355_v49 = vsel %vm351_vm3, %v348_v44, %v1405_v47  ;;  %1115 = vmatmul.mubr.msk.bf16.vlgmr.msra.gmra.mrb[0].mxu1 %vm508_vm4, %v1403_v46 }
  0xb2   : > { %526 = vmatprep.subr.bf16.mxu0 %v355_v49  ;;  %v354_v50 = vsel %vm351_vm3, %v346_v48, %v348_v44  ;;  %630 = vmatprep.mubr.bf16.mxu1 %v1356_v7 }
  0xb3   : > { %527 = vmatpush1.bf16.msra.mxu0 %v354_v50 }
  0xb4   : > { %v367_v51 = vpop.permute.xlu0 %366 }
  0xb5   : > { %v365_v52 = vpop.permute.xlu1 %364  ;;  %1131 = vmatprep.subr.bf16.mxu1 %v367_v51 }
  0xb6   : > { %v376_v53 = vsel %vm374_vm5, %v365_v52, %v367_v51  ;;  %1132 = vmatpush3.bf16.msra.mxu1 %v1320_v2 }
  0xb7   : > { %528 = vmatprep.subr.bf16.mxu0 %v376_v53 }
  0xb8   : > { %v363_v54 = vpop.permute.xlu0 %362 }
  0xb9   : > { %v373_v55 = vpop.permute.xlu1 %372  ;;  %v375_v56 = vsel %vm374_vm5, %v363_v54, %v365_v52 }
  0xba   : > { %529 = vmatpush1.bf16.msra.mxu0 %v375_v56  ;;  %1133 = vmatprep.subr.bf16.mxu1 %v373_v55 }
  0xbb   : > { %1134 = vmatpush3.bf16.msra.mxu1 %v1326_v5 }
  0xbc   : > { %v371_v57 = vpop.permute.xlu0 %370 }
  0xbd   : > { %v369_v58 = vpop.permute.xlu1 %368  ;;  %v378_v59 = vsel %vm374_vm5, %v371_v57, %v373_v55 }
  0xbe   : > { %530 = vmatprep.subr.bf16.mxu0 %v378_v59  ;;  %v377_v60 = vsel %vm374_vm5, %v369_v58, %v371_v57 }
  0xbf   : > { %531 = vmatpush1.bf16.msra.mxu0 %v377_v60 }
  0xc0   : > { %v390_v61 = vpop.permute.xlu0 %389 }
  0xc1   : > { %v388_v62 = vpop.permute.xlu1 %387  ;;  %1135 = vmatprep.subr.bf16.mxu1 %v390_v61 }
  0xc2   : > { %v399_v63 = vsel %vm397_vm6, %v388_v62, %v390_v61  ;;  %1136 = vmatpush3.bf16.msra.mxu1 %v1369_v12 }
  0xc3   : > { %532 = vmatprep.subr.bf16.mxu0 %v399_v63 }
  0xc4   : > { %v386_v0 = vpop.permute.xlu0 %385 }
  0xc5   : > { %v396_v1 = vpop.permute.xlu1 %395  ;;  %v398_v2 = vsel %vm397_vm6, %v386_v0, %v388_v62 }
  0xc6   : > { %1137 = vmatprep.subr.bf16.mxu1 %v396_v1  ;;  %533 = vmatpush1.bf16.msra.mxu0 %v398_v2 }
  0xc7   : > { %1138 = vmatpush3.bf16.msra.mxu1 %v1372_v16 }
  0xc8   : > { %v394_v3 = vpop.permute.xlu0 %393 }
  0xc9   : > { %v392_v4 = vpop.permute.xlu1 %391  ;;  %v401_v5 = vsel %vm397_vm6, %v394_v3, %v396_v1 }
  0xca   : > { %534 = vmatprep.subr.bf16.mxu0 %v401_v5  ;;  %v400_v6 = vsel %vm397_vm6, %v392_v4, %v394_v3 }
  0xcb   : > { %535 = vmatpush1.bf16.msra.mxu0 %v400_v6 }
  0xcc   : > { %v413_v7 = vpop.permute.xlu0 %412 }
  0xcd   : > { %v411_v8 = vpop.permute.xlu1 %410  ;;  %1139 = vmatprep.subr.bf16.mxu1 %v413_v7 }
  0xce   : > { %v422_v9 = vsel %vm420_vm7, %v411_v8, %v413_v7  ;;  %1140 = vmatpush3.bf16.msra.mxu1 %v1375_v21 }
  0xcf   : > { %536 = vmatprep.subr.bf16.mxu0 %v422_v9 }
  0xd0   : > { %v409_v10 = vpop.permute.xlu0 %408 }
  0xd1   : > { %v419_v11 = vpop.permute.xlu1 %418  ;;  %v421_v12 = vsel %vm420_vm7, %v409_v10, %v411_v8 }
  0xd2   : > { %1141 = vmatprep.subr.bf16.mxu1 %v419_v11  ;;  %537 = vmatpush1.bf16.msra.mxu0 %v421_v12 }
  0xd3   : > { %1142 = vmatpush3.bf16.msra.mxu1 %v1380_v26 }
  0xd4   : > { %v417_v13 = vpop.permute.xlu0 %416 }
  0xd5   : > { %v415_v14 = vpop.permute.xlu1 %414  ;;  %v424_v15 = vsel %vm420_vm7, %v417_v13, %v419_v11 }
  0xd6   : > { %538 = vmatprep.subr.bf16.mxu0 %v424_v15  ;;  %v423_v16 = vsel %vm420_vm7, %v415_v14, %v417_v13  ;;  %vm759_vm7 = vcmask 130048  }
  0xd7   : > { %539 = vmatpush1.bf16.msra.mxu0 %v423_v16 }
  0xd8   : > { %v436_v17 = vpop.permute.xlu0 %435 }
  0xd9   : > { %v434_v18 = vpop.permute.xlu1 %433  ;;  %1143 = vmatprep.subr.bf16.mxu1 %v436_v17 }
  0xda   : > { %v445_v19 = vsel %vm443_vm8, %v434_v18, %v436_v17  ;;  %1144 = vmatpush3.bf16.msra.mxu1 %v1390_v36  ;;  %v682_v36 = vadd.s32 128, %v681_v35 }
  0xdb   : > { %540 = vmatprep.subr.bf16.mxu0 %v445_v19 }
  0xdc   : > { %v432_v20 = vpop.permute.xlu0 %431  ;;  %v1449_v40 = vmul.u32.u64.low 3817748708, %v682_v36  ;;  %v1450_v41 = vmul.u32.u64.high 3817748708, %v682_v36, %v1449_v40 }
  0xdd   : > { %v442_v21 = vpop.permute.xlu1 %441  ;;  %v444_v22 = vsel %vm443_vm8, %v432_v20, %v434_v18 }
  0xde   : > { %1145 = vmatprep.subr.bf16.mxu1 %v442_v21  ;;  %541 = vmatpush1.bf16.msra.mxu0 %v444_v22  ;;  %v701_v44 = vshrl.u32 %v1450_v41, 4  ;;  %v757_v41 = vld [vmem:[%s1549_s3] sm:$0xff] }
  0xdf   : > { %1146 = vmatpush3.bf16.msra.mxu1 %v1405_v47 }
  0xe0   : > { %v440_v24 = vpop.permute.xlu0 %439  ;;  %1164 = vmatprep.subr.bf16.mxu1 %v1264_v25  ;;  %v702_v47 = vmul.u32 18, %v701_v44  ;;  %v758_v44 = vld [vmem:[%s1549_s3 + $0x8] sm:$0xff] }
  0xe1   : > { %v438_v26 = vpop.permute.xlu1 %437  ;;  %v447_v27 = vsel %vm443_vm8, %v440_v24, %v442_v21 }
  0xe2   : > { %631 = vmatmul.mubr.bf16.vlgmr.msra.gmra.mrb[4].mxu1 %v1240_v23  ;;  %542 = vmatprep.subr.bf16.mxu0 %v447_v27  ;;  %v446_v28 = vsel %vm443_vm8, %v438_v26, %v440_v24  ;;  %v703_v50 = vsub.s32 %v682_v36, %v702_v47 }
  0xe3   : > { %1165 = vmatpush3.bf16.msra.mxu1 %v1384_v29  ;;  %543 = vmatpush1.bf16.msra.mxu0 %v446_v28  ;;  %v1446_v29 = vmul.u32.u64.low 3817748708, %v681_v35  ;;  %v1447_v38 = vmul.u32.u64.high 3817748708, %v681_v35, %v1446_v29 }
  0xe4   : > { %1166 = vmatprep.subr.bf16.mxu1 %v1264_v25  ;;  %1168 = vmatprep.mubr.msk.bf16.mxu1 %vm1265_vm9, %v1264_v25  ;;  %vm718_vm12 = vcmp.ne.s32.totalorder %v703_v50, 0  ;;  %vm721_vm13 = vcmp.lt.s32.totalorder %v703_v50, 0  ;;  %v727_v55 = vadd.s32 18, %v703_v50 }
  0xe5   : > { %v690_v43 = vshrl.u32 %v1447_v38, 4  ;;  %vm1462_vm1 = vmand %vm721_vm13, %vm718_vm12  ;;  %vm1040_vm13 = vcmask 257024  }
  0xe6   : > { %545 = vmatmul.mubr.bf16.vlgmr.msra.gmra.mrb[0].mxu0 %v1240_v23  ;;  %v730_v3 = vsel %vm1462_vm1, %v727_v55, %v703_v50 }
  0xe7   : > { %1167 = vmatpush3.bf16.msra.mxu1 %v1394_v39  ;;  %v1452_v42 = vmul.u32.u64.low 3817748708, %v683_v37  ;;  %v1453_v39 = vmul.u32.u64.high 3817748708, %v683_v37, %v1452_v42  ;;  %vm1480_vm5 = vcmp.lt.s32.totalorder %v730_v3, 16 }
  0xe9   : > { %v712_v45 = vshrl.u32 %v1453_v39, 4 }
  0xea   : > { %1169 = vmatmul.mubr.msk.bf16.vlgmr.msra.gmra.mrb[8].mxu1 %vm508_vm4, %v1403_v46  ;;  %v691_v46 = vmul.u32 18, %v690_v43 }
  0xeb   : > { %v713_v48 = vmul.u32 18, %v712_v45  ;;  %1176 = vmatprep.mubr.msk.f32.mxu1 %vm759_vm7, %v757_v41 }
  0xec   : > { %v692_v49 = vsub.s32 %v681_v35, %v691_v46 }
  0xed   : > { %v714_v51 = vsub.s32 %v683_v37, %v713_v48 }
  0xee   : > { %vm717_vm10 = vcmp.ne.s32.totalorder %v692_v49, 0  ;;  %vm720_vm11 = vcmp.lt.s32.totalorder %v692_v49, 0  ;;  %v726_v52 = vadd.s32 18, %v692_v49 }
  0xef   : > { %vm719_vm14 = vcmp.ne.s32.totalorder %v714_v51, 0  ;;  %vm722_vm15 = vcmp.lt.s32.totalorder %v714_v51, 0  ;;  %vm1458_vm0 = vmand %vm720_vm11, %vm717_vm10  ;;  %v728_v57 = vadd.s32 18, %v714_v51 }
  0xf0   : > { %vm1466_vm2 = vmand %vm722_vm15, %vm719_vm14  ;;  %v729_v63 = vsel %vm1458_vm0, %v726_v52, %v692_v49 }
  0xf1   : > { %v486_v0 = vpop.permute.xlu0 %485  ;;  %v731_v6 = vsel %vm1466_vm2, %v728_v57, %v714_v51  ;;  %vm1476_vm3 = vcmp.lt.s32.totalorder %v729_v63, 16 }
  0xf2   : > { %v491_v7 = vpop.permute.xlu1 %490  ;;  %vm1484_vm6 = vcmp.lt.s32.totalorder %v731_v6, 16 }
 0x184   : > { %v589_v30 = vpop.f32.mrb[0].mxu1 }
 0x185   : > { %v591_v31 = vpop.f32.mrb[1].mxu1 }
 0x186   : > { %v593_v32 = vpop.f32.mrb[2].mxu1 }
 0x187   : > { %v1444_v33 = vpop.f32.mrb[3].mxu1 }
 0x1b5   : > { %v1147_v53 = vpop.f32.mrb[4].mxu1 }
 0x1b6   : > { %v1148_v56 = vpop.f32.mrb[5].mxu1 }
 0x1b7   : > { %v1149_v59 = vadd.f32 %v1148_v56, %v1147_v53  ;;  %v1150_v60 = vpop.f32.mrb[6].mxu1 }
 0x1b8   : > { %v1151_v62 = vpop.f32.mrb[7].mxu1 }
 0x1b9   : > { %v1152_v1 = vadd.f32 %v1151_v62, %v1150_v60  ;;  %v546_v2 = vpop.f32.mrb[0].mxu0  ;;  %v633_v14 = vadd.f32 %v1149_v59, %v486_v0 }
 0x1ba   : > { %v547_v4 = vadd.f32 %v546_v2, %v486_v0  ;;  %v548_v5 = vpop.f32.mrb[1].mxu0 }
 0x1bb   : > { %v549_v8 = vadd.f32 %v548_v5, %v486_v0  ;;  %v550_v9 = vpop.f32.mrb[2].mxu0  ;;  %v636_v23 = vadd.f32 %v1152_v1, %v491_v7 }
 0x1bc   : > { %v590_v11 = vadd.f32 %v589_v30, %v547_v4  ;;  %v551_v12 = vadd.f32 %v550_v9, %v491_v7  ;;  %v552_v13 = vpop.f32.mrb[3].mxu0 }
 0x1bd   : > { %v592_v16 = vadd.f32 %v591_v31, %v549_v8  ;;  %v553_v17 = vadd.f32 %v552_v13, %v491_v7  ;;  %v673_v18 = vpop.f32.mrb[8].mxu1 }
 0x1be   : > { %v594_v20 = vadd.f32 %v593_v32, %v551_v12  ;;  %v674_v21 = vadd.f32 %v673_v18, %v633_v14  ;;  %v1170_v22 = vpop.f32.mrb[9].mxu1  ;;  %v741_v24 = vsel %vm1476_vm3, %v590_v11, 0.0 }
 0x1bf   : > { %v596_v25 = vadd.f32 %v1444_v33, %v553_v17  ;;  %v676_v26 = vpop.f32.mrb[10].mxu1  ;;  %v742_v27 = vsel %vm1480_vm5, %v592_v16, 0.0 }
 0x1c0   : > { %v743_v28 = vsel %vm1484_vm6, %v674_v21, 0.0  ;;  %v677_v30 = vadd.f32 %v676_v26, %v636_v23  ;;  %v1171_v31 = vpop.f32.mrb[11].mxu1  ;;  %v747_v34 = vadd.f32 %v742_v27, %v741_v24  ;;  %v744_v32 = vsel %vm1476_vm3, %v594_v20, 0.0  ;;  %v983_v26 = vld [vmem:[%s1551_s5] sm:$0xff]  ;;  %v984_v27 = vld [vmem:[%s1551_s5 + $0x8] sm:$0xff] }
 0x1c1   : > { %v748_v35 = vsel %vm508_vm4, %v743_v28, 0.0  ;;  %v745_v36 = vsel %vm1480_vm5, %v596_v25, 0.0 }
 0x1c2   : > { %v746_v33 = vsel %vm1484_vm6, %v677_v30, 0.0  ;;  %v749_v37 = vadd.f32 %v748_v35, %v747_v34  ;;  %v752_v29 = vadd.f32 %v745_v36, %v744_v32 }
 0x1c3   : > { %v753_v38 = vsel %vm508_vm4, %v746_v33, 0.0 }
 0x1c4   : > { %750 = vadd.xlane.f32.xlu1 %v749_v37  ;;  %v754_v40 = vadd.f32 %v753_v38, %v752_v29 }
 0x1c6   : > { %755 = vadd.xlane.f32.xlu0 %v754_v40 }
 0x251   : > { %v751_v42 = vpop.xlane.xlu1 %750 }
 0x253   : > { %v756_v39 = vpop.xlane.xlu0 %755 }
 0x254   : > { %v1186_v43 = vpack.c.bf16 %v756_v39, %v751_v42 }
 0x256   : > { %1187 = vmatprep.subr.bf16.mxu1 %v1186_v43 }
 0x257   : > { %1189 = vmatpush3.bf16.msra.mxu1 %v1186_v43 }
 0x25a   : > { %1177 = vmatmul.mubr.msk.f32.vlgmr.msra.gmra.mrb[12].mxu1 %vm759_vm7, %v758_v44 }
 0x25b   : > { %1183 = vmatprep.mubr.msk.f32.mxu1 %vm759_vm7, %v757_v41 }
 0x32d   : > { %v1178_v45 = vpop.f32.mrb[12].mxu1 }
 0x32e   : > { %v843_v46 = vmul.f32 0.00390625, %v1178_v45  ;;  %v832_v47 = vpop.f32.mrb[13].mxu1 }
 0x32f   : > { %v842_v48 = vmul.f32 0.00390625, %v832_v47 }
 0x330   : > { %851 = vperm.xlu1 %1230, %v843_v46  }
 0x331   : > { %846 = vperm.xlu0 %1229, %v842_v48  }
 0x3af   : > { %v852_v49 = vpop.permute.xlu1 %851 }
 0x3b0   : > { %v857_v50 = vsub.f32 %v594_v20, %v852_v49  ;;  %v858_v51 = vsub.f32 %v596_v25, %v852_v49  ;;  %v859_v52 = vsub.f32 %v677_v30, %v852_v49  ;;  %v847_v53 = vpop.permute.xlu0 %846  ;;  %v964_v20 = vld [vmem:[%s1550_s4 + $0x8] sm:$0xff] }
 0x3b1   : > { %v854_v54 = vsub.f32 %v590_v11, %v847_v53  ;;  %v855_v55 = vsub.f32 %v592_v16, %v847_v53  ;;  %v856_v56 = vsub.f32 %v674_v21, %v847_v53  ;;  %v963_v21 = vld [vmem:[%s1550_s4] sm:$0xff] }
 0x3b2   : > { %v863_v57 = vsel %vm1476_vm3, %v857_v50, 0.0  ;;  %v864_v58 = vsel %vm1480_vm5, %v858_v51, 0.0  ;;  %v865_v59 = vsel %vm1484_vm6, %v859_v52, 0.0 }
 0x3b3   : > { %v860_v60 = vsel %vm1476_vm3, %v854_v54, 0.0  ;;  %v861_v61 = vsel %vm1480_vm5, %v855_v55, 0.0  ;;  %v869_v62 = vmul.f32 %v863_v57, %v863_v57  ;;  %v870_v63 = vmul.f32 %v864_v58, %v864_v58 }
 0x3b4   : > { %v871_v0 = vmul.f32 %v865_v59, %v865_v59  ;;  %v862_v1 = vsel %vm1484_vm6, %v856_v56, 0.0  ;;  %v866_v2 = vmul.f32 %v860_v60, %v860_v60  ;;  %v867_v3 = vmul.f32 %v861_v61, %v861_v61 }
 0x3b5   : > { %v877_v4 = vadd.f32 %v870_v63, %v869_v62  ;;  %v868_v5 = vmul.f32 %v862_v1, %v862_v1 }
 0x3b6   : > { %v878_v6 = vsel %vm508_vm4, %v871_v0, 0.0  ;;  %v872_v7 = vadd.f32 %v867_v3, %v866_v2 }
 0x3b7   : > { %v879_v8 = vadd.f32 %v878_v6, %v877_v4  ;;  %v873_v9 = vsel %vm508_vm4, %v868_v5, 0.0 }
 0x3b8   : > { %v874_v10 = vadd.f32 %v873_v9, %v872_v7 }
 0x3b9   : > { %880 = vadd.xlane.f32.xlu0 %v879_v8 }
 0x3ba   : > { %875 = vadd.xlane.f32.xlu1 %v874_v10 }
 0x446   : > { %v881_v11 = vpop.xlane.xlu0 %880 }
 0x447   : > { %v876_v12 = vpop.xlane.xlu1 %875 }
 0x448   : > { %v1190_v13 = vpack.c.bf16 %v881_v11, %v876_v12 }
 0x44a   : > { %1191 = vmatprep.subr.bf16.mxu1 %v1190_v13 }
 0x44b   : > { %1193 = vmatpush3.bf16.msra.mxu1 %v1190_v13 }
 0x44e   : > { %1184 = vmatmul.mubr.msk.f32.vlgmr.msra.gmra.mrb[14].mxu1 %vm759_vm7, %v758_v44 }
 0x521   : > { %v1185_v14 = vpop.f32.mrb[14].mxu1 }
 0x522   : > { %v958_v15 = vmul.f32 0.00390625, %v1185_v14  ;;  %v948_v16 = vpop.f32.mrb[15].mxu1 }
 0x523   : > { %v957_v17 = vmul.f32 0.00390625, %v948_v16 }
 0x524   : > { %v960_v18 = vadd.f32 1e-05, %v958_v15 }
 0x525   : > { %v959_v19 = vadd.f32 1e-05, %v957_v17 }
 0x526   : > { %1243 = vrsqrt.f32 %v960_v18 }
 0x527   : > { %1245 = vrsqrt.f32 %v959_v19 }
 0x530   : > { %v1244_v22 = vpop.eup %1243 }
 0x531   : > { %v1246_v23 = vpop.eup %1245  ;;  %v966_v24 = vmul.f32 %v1244_v22, %v964_v20 }
 0x532   : > { %v965_v25 = vmul.f32 %v1246_v23, %v963_v21 }
 0x533   : > { %974 = vperm.xlu1 %1230, %v966_v24  }
 0x534   : > { %969 = vperm.xlu0 %1229, %v965_v25  }
 0x537   : > { %987 = vperm.xlu1 %1230, %v983_v26  }
 0x538   : > { %992 = vperm.xlu0 %1229, %v984_v27  }
 0x5b2   : > { %v975_v28 = vpop.permute.xlu1 %974 }
 0x5b3   : > { %v970_v30 = vpop.permute.xlu0 %969  ;;  %v980_v35 = vmul.f32 %v975_v28, %v857_v50  ;;  %v981_v36 = vmul.f32 %v975_v28, %v858_v51  ;;  %v982_v33 = vmul.f32 %v975_v28, %v859_v52 }
 0x5b4   : > { %v977_v31 = vmul.f32 %v970_v30, %v854_v54  ;;  %v978_v34 = vmul.f32 %v970_v30, %v855_v55  ;;  %v979_v32 = vmul.f32 %v970_v30, %v856_v56 }
 0x5b6   : > { %v988_v37 = vpop.permute.xlu1 %987 }
 0x5b7   : > { %v995_v29 = vadd.f32 %v988_v37, %v977_v31  ;;  %v996_v38 = vadd.f32 %v988_v37, %v978_v34  ;;  %v997_v40 = vadd.f32 %v988_v37, %v979_v32  ;;  %v993_v41 = vpop.permute.xlu0 %992 }
 0x5b8   : > { %v998_v42 = vadd.f32 %v993_v41, %v980_v35  ;;  %v999_v39 = vadd.f32 %v993_v41, %v981_v36  ;;  %v1000_v43 = vadd.f32 %v993_v41, %v982_v33 }
 0x5b9   : > { %vm1001_vm4 = vcmp.gt.f32.partialorder %v995_v29, 0.0  ;;  %vm1002_vm8 = vcmp.gt.f32.partialorder %v996_v38, 0.0  ;;  %vm1003_vm9 = vcmp.gt.f32.partialorder %v997_v40, 0.0  ;;  %v1007_v44 = vmul.f32 0.2, %v995_v29 }
 0x5ba   : > { %v1008_v45 = vmul.f32 0.2, %v996_v38  ;;  %v1009_v46 = vmul.f32 0.2, %v997_v40  ;;  %vm1004_vm10 = vcmp.gt.f32.partialorder %v998_v42, 0.0  ;;  %vm1005_vm11 = vcmp.gt.f32.partialorder %v999_v39, 0.0 }
 0x5bb   : > { %v1013_v47 = vsel %vm1001_vm4, %v995_v29, %v1007_v44  ;;  %vm1006_vm12 = vcmp.gt.f32.partialorder %v1000_v43, 0.0  ;;  %v1010_v48 = vmul.f32 0.2, %v998_v42  ;;  %v1011_v49 = vmul.f32 0.2, %v999_v39 }
 0x5bc   : > { %v1014_v50 = vsel %vm1002_vm8, %v996_v38, %v1008_v45  ;;  %v1015_v51 = vsel %vm1003_vm9, %v997_v40, %v1009_v46  ;;  %v1012_v52 = vmul.f32 0.2, %v1000_v43 }
 0x5bd   : > { %v1127_v53 = vpack.c.bf16 %v1014_v50, %v1013_v47  ;;  %v1128_v54 = vpack.c.bf16 %v1015_v51, %v1015_v51  ;;  %v1016_v55 = vsel %vm1004_vm10, %v998_v42, %v1010_v48  ;;  %v1017_v56 = vsel %vm1005_vm11, %v999_v39, %v1011_v49 }
 0x5be   : > { %v1018_v57 = vsel %vm1006_vm12, %v1000_v43, %v1012_v52  ;;  %v1129_v58 = vpack.c.bf16 %v1017_v56, %v1016_v55 }
 0x5bf   : > { %1039 = vst [vmem:[%s251_s14] sm:$0xff] %v1127_v53  ;;  %1041 = vst.msk [vmem:[%s251_s14 + $0x8] sm:$0xf] %vm1040_vm13, %v1128_v54  ;;  %v1130_v59 = vpack.c.bf16 %v1018_v57, %v1018_v57 }
 0x5c0   : > { %1042 = vst [vmem:[%s251_s14 + $0xc] sm:$0xff] %v1129_v58 }
 0x5c1   : > { %1043 = vst.msk [vmem:[%s251_s14 + $0x14] sm:$0xf] %vm1040_vm13, %v1130_v59 }
 0x5c2 PF: > { %s16_s21 = sadd.s32 1, %s1253_s21  }
 0x5c3   : > { %p13_p4 = scmp.ge.s32.totalorder %s16_s21, 4  }
 0x5c5   :  { %15 = sbr.rel (!%p13_p4) target bundleno = 1 (0x1), region = 74 }

// kernel: dcgan64_decoder_forward.5
= control target key start
LH: loop header
LB: loop body
LE: loop exit
PB: predicated region body
PF: predicated region fallthrough
CT: control target
= control target key end

     0   :  { %s937_s12 = smov 0   ;;  %s1285_s0 = inlined_call_operand.vmem [shape: bf16[2,16,1190], index: 0, kind: input, shape index: {}]   ;;  %s1286_s1 = inlined_call_operand.vmem [shape: bf16[4,144], index: 1, kind: input, shape index: {}]   ;;  %s1287_s2 = inlined_call_operand.vmem [shape: f32[4,1], index: 2, kind: input, shape index: {}]   ;;  %s1288_s3 = inlined_call_operand.vmem [shape: f32[2,4,1088], index: 3, kind: output, shape index: {}]  }
   0x1 LB: > { %s837_s13 = sadd.s32 4294967295, %s906_s12   ;;  %p841_p0 = scmp.ge.s32.totalorder %s906_s12, 1  ;;  %s906_s12 = sphi %s937_s12, %s13_s12  }
   0x2   : > { %p137_p1 = scmp.lt.s32.totalorder %s906_s12, 3 }
   0x4   : > { %p138_p2 = pnand %p841_p0, %p137_p1 }
   0x5   : > { %p161_p3 = scmp.lt.s32.totalorder (!%p138_p2), %s837_s13, 1  ;;  %s908_s18 = smov (!%p138_p2), 127   ;;  %v981_v4 = vld.sshfl [vmem:[%s1286_s1] sm:$0x33 pattern:$0x76325410] (!%p138_p2) }
   0x6   : > { %141 = sbr.rel (%p138_p2) target bundleno = 501 (0x1f5), region = 32  ;;  %s909_s19 = smov (!%p138_p2), 126   ;;  %v985_v5 = vcombine.high (!%p138_p2), %v981_v4, %v981_v4  ;;  %vm552_vm0 = vcmask (!%p138_p2), 130048   ;;  %v916_v9 = vmov (!%p138_p2), 0   ;;  %vm248_vm1 = vcmask (!%p138_p2), 1039360  }
   0x7   : > { %s910_s20 = smov (!%p138_p2), 94   ;;  %s911_s21 = smov (!%p138_p2), 93   ;;  %883 = vset.pattern.permute.xlu0 (!%p138_p2), %v916_v9  ;;  %882 = vset.pattern.permute.xlu1 (!%p138_p2), %v916_v9  ;;  %vm284_vm2 = vcmask (!%p138_p2), 1031168   ;;  %vm320_vm3 = vcmask (!%p138_p2), 769024   ;;  %vm356_vm4 = vcmask (!%p138_p2), 760832   ;;  %vm392_vm5 = vcmask (!%p138_p2), 752640  }
   0x8   : > { %s912_s22 = smov (!%p138_p2), 92   ;;  %s913_s23 = smov (!%p138_p2), 60   ;;  %856 = vmatprep.mubr.msk.bf16.mxu0 (!%p138_p2), %vm552_vm0, %v985_v5  ;;  %857 = vmatprep.mubr.msk.bf16.mxu1 (!%p138_p2), %vm552_vm0, %v985_v5  ;;  %vm438_vm6 = vcmask (!%p138_p2), 490496   ;;  %v536_v41 = vld [vmem:[%s1287_s2] sm:$0xf] (!%p138_p2)  ;;  %vm477_vm7 = vcmask (!%p138_p2), 482304  }
   0x9   : > { %s914_s26 = smov (!%p138_p2), 59   ;;  %s915_s27 = smov (!%p138_p2), 58   ;;  %vm516_vm8 = vcmask (!%p138_p2), 474112   ;;  %vm780_vm9 = vcmask (!%p138_p2), 519168  }
   0xd   : > { %s1290_s13 = smov (!%p161_p3, %s837_s13), 1 }
   0xe   : > { %s863_s14 = smul.u32 80, %s1290_s13 }
   0xf   : > { %s864_s30 = smul.u32 36, %s1290_s13 }
  0x10   : > { %s951_s17 = scalar_lea.vmem %s1285_s0, %s863_s14 }
  0x11   : > { %v884_v0 = vld [vmem:[%s951_s17 + $0x4] ss:$40 sps:$4 sm:$0xff]   ;;  %v886_v1 = vld [vmem:[%s951_s17] ss:$40 sps:$4 sm:$0xff]   ;;  %v998_v6 = vld [vmem:[%s951_s17 + $0x10] ss:$40 sps:$4 sm:$0xff]   ;;  %s1275_s6 = scalar_lea.vmem %s1288_s3, %s864_s30 }
  0x12   : > { %232 = vrot.lane.b32.xlu0 %v884_v0, %s908_s18  ;;  %v887_v2 = vld [vmem:[%s951_s17 + $0x8] ss:$40 sps:$4 sm:$0xff]   ;;  %v958_v3 = vld [vmem:[%s951_s17 + $0xc] ss:$40 sps:$4 sm:$0xff]   ;;  %556 = vmatprep.subr.bf16.mxu0 %v884_v0  ;;  %v1008_v8 = vld [vmem:[%s951_s17 + $0x18] ss:$40 sps:$4 sm:$0xff]  }
  0x13   : > { %230 = vrot.lane.b32.xlu1 %v886_v1, %s908_s18  ;;  %557 = vmatpush1.bf16.msra.mxu0 %v886_v1  ;;  %v1003_v7 = vld [vmem:[%s951_s17 + $0x14] ss:$40 sps:$4 sm:$0xff]   ;;  %v1076_v11 = vld [vmem:[%s951_s17 + $0x20] ss:$40 sps:$4 sm:$0xff]   ;;  %v899_v29 = vld [vmem:[%s951_s17 + $0x24] ss:$40 sps:$4 sm:$0xff]  }
  0x14   : > { %597 = vmatprep.subr.bf16.mxu1 %v958_v3  ;;  %v1071_v10 = vld [vmem:[%s951_s17 + $0x1c] ss:$40 sps:$4 sm:$0xff]   ;;  %v897_v25 = vld [vmem:[%s951_s17 + $0x20] ss:$40 sps:$4 sm:$0xff]  }
  0x15   : > { %598 = vmatpush1.bf16.msra.mxu1 %v887_v2 }
  0x16   : > { %234 = vrot.lane.b32.xlu0 %v887_v2, %s908_s18 }
  0x17   : > { %268 = vrot.lane.b32.xlu1 %v884_v0, %s909_s19 }
  0x1a   : > { %270 = vrot.lane.b32.xlu0 %v887_v2, %s909_s19 }
  0x1b   : > { %266 = vrot.lane.b32.xlu1 %v886_v1, %s909_s19 }
  0x1e   : > { %304 = vrot.lane.b32.xlu0 %v884_v0, %s910_s20 }
  0x1f   : > { %306 = vrot.lane.b32.xlu1 %v887_v2, %s910_s20 }
  0x22   : > { %302 = vrot.lane.b32.xlu0 %v886_v1, %s910_s20 }
  0x23   : > { %340 = vrot.lane.b32.xlu1 %v884_v0, %s911_s21 }
  0x26   : > { %342 = vrot.lane.b32.xlu0 %v887_v2, %s911_s21 }
  0x27   : > { %338 = vrot.lane.b32.xlu1 %v886_v1, %s911_s21 }
  0x2a   : > { %376 = vrot.lane.b32.xlu0 %v884_v0, %s912_s22 }
  0x2b   : > { %378 = vrot.lane.b32.xlu1 %v887_v2, %s912_s22 }
  0x2e   : > { %374 = vrot.lane.b32.xlu0 %v886_v1, %s912_s22 }
  0x2f   : > { %420 = vrot.lane.b32.xlu1 %v884_v0, %s913_s23 }
  0x32   : > { %422 = vrot.lane.b32.xlu0 %v887_v2, %s913_s23 }
  0x33   : > { %418 = vrot.lane.b32.xlu1 %v886_v1, %s913_s23 }
  0x36   : > { %459 = vrot.lane.b32.xlu0 %v884_v0, %s914_s26 }
  0x37   : > { %461 = vrot.lane.b32.xlu1 %v887_v2, %s914_s26 }
  0x3a   : > { %457 = vrot.lane.b32.xlu0 %v886_v1, %s914_s26 }
  0x3b   : > { %498 = vrot.lane.b32.xlu1 %v884_v0, %s915_s27 }
  0x3e   : > { %500 = vrot.lane.b32.xlu0 %v887_v2, %s915_s27 }
  0x3f   : > { %496 = vrot.lane.b32.xlu1 %v886_v1, %s915_s27 }
  0x42   : > { %236 = vrot.lane.b32.xlu0 %v958_v3, %s908_s18 }
  0x43   : > { %238 = vrot.lane.b32.xlu1 %v998_v6, %s908_s18 }
  0x46   : > { %240 = vrot.lane.b32.xlu0 %v1003_v7, %s908_s18 }
  0x47   : > { %242 = vrot.lane.b32.xlu1 %v1008_v8, %s908_s18 }
  0x4a   : > { %272 = vrot.lane.b32.xlu0 %v958_v3, %s909_s19 }
  0x4b   : > { %274 = vrot.lane.b32.xlu1 %v998_v6, %s909_s19 }
  0x4e   : > { %276 = vrot.lane.b32.xlu0 %v1003_v7, %s909_s19 }
  0x4f   : > { %278 = vrot.lane.b32.xlu1 %v1008_v8, %s909_s19 }
  0x52   : > { %308 = vrot.lane.b32.xlu0 %v958_v3, %s910_s20 }
  0x53   : > { %310 = vrot.lane.b32.xlu1 %v998_v6, %s910_s20 }
  0x56   : > { %312 = vrot.lane.b32.xlu0 %v1003_v7, %s910_s20 }
  0x57   : > { %314 = vrot.lane.b32.xlu1 %v1008_v8, %s910_s20 }
  0x5a   : > { %344 = vrot.lane.b32.xlu0 %v958_v3, %s911_s21 }
  0x5b   : > { %346 = vrot.lane.b32.xlu1 %v998_v6, %s911_s21 }
  0x5e   : > { %348 = vrot.lane.b32.xlu0 %v1003_v7, %s911_s21 }
  0x5f   : > { %350 = vrot.lane.b32.xlu1 %v1008_v8, %s911_s21 }
  0x62   : > { %380 = vrot.lane.b32.xlu0 %v958_v3, %s912_s22 }
  0x63   : > { %382 = vrot.lane.b32.xlu1 %v998_v6, %s912_s22 }
  0x66   : > { %384 = vrot.lane.b32.xlu0 %v1003_v7, %s912_s22 }
  0x67   : > { %386 = vrot.lane.b32.xlu1 %v1008_v8, %s912_s22 }
  0x6a   : > { %424 = vrot.lane.b32.xlu0 %v958_v3, %s913_s23 }
  0x6b   : > { %426 = vrot.lane.b32.xlu1 %v998_v6, %s913_s23 }
  0x6e   : > { %428 = vrot.lane.b32.xlu0 %v1003_v7, %s913_s23 }
  0x6f   : > { %430 = vrot.lane.b32.xlu1 %v1008_v8, %s913_s23 }
  0x72   : > { %463 = vrot.lane.b32.xlu0 %v958_v3, %s914_s26 }
  0x73   : > { %465 = vrot.lane.b32.xlu1 %v998_v6, %s914_s26 }
  0x76   : > { %467 = vrot.lane.b32.xlu0 %v1003_v7, %s914_s26 }
  0x77   : > { %469 = vrot.lane.b32.xlu1 %v1008_v8, %s914_s26 }
  0x7a   : > { %502 = vrot.lane.b32.xlu0 %v958_v3, %s915_s27 }
  0x7b   : > { %504 = vrot.lane.b32.xlu1 %v998_v6, %s915_s27 }
  0x7e   : > { %506 = vrot.lane.b32.xlu0 %v1003_v7, %s915_s27 }
  0x7f   : > { %508 = vrot.lane.b32.xlu1 %v1008_v8, %s915_s27 }
  0x82   : > { %244 = vrot.lane.b32.xlu0 %v1071_v10, %s908_s18 }
  0x83   : > { %246 = vrot.lane.b32.xlu1 %v1076_v11, %s908_s18 }
  0x84   : > { %v233_v12 = vpop.permute.xlu0 %232 }
  0x85   : > { %v231_v13 = vpop.permute.xlu1 %230 }
  0x86   : > { %280 = vrot.lane.b32.xlu0 %v1071_v10, %s909_s19  ;;  %v249_v17 = vsel %vm248_vm1, %v231_v13, %v233_v12 }
  0x87   : > { %282 = vrot.lane.b32.xlu1 %v1076_v11, %s909_s19 }
  0x88   : > { %v1086_v14 = vpop.permute.xlu0 %234 }
  0x89   : > { %v269_v15 = vpop.permute.xlu1 %268  ;;  %v250_v16 = vsel %vm248_vm1, %v233_v12, %v1086_v14 }
  0x8a   : > { %316 = vrot.lane.b32.xlu0 %v1071_v10, %s910_s20  ;;  %558 = vmatprep.subr.bf16.mxu0 %v250_v16 }
  0x8b   : > { %318 = vrot.lane.b32.xlu1 %v1076_v11, %s910_s20  ;;  %559 = vmatpush1.bf16.msra.mxu0 %v249_v17 }
  0x8c   : > { %v1095_v18 = vpop.permute.xlu0 %270 }
  0x8d   : > { %v267_v19 = vpop.permute.xlu1 %266  ;;  %v286_v20 = vsel %vm284_vm2, %v269_v15, %v1095_v18 }
  0x8e   : > { %352 = vrot.lane.b32.xlu0 %v1071_v10, %s911_s21  ;;  %560 = vmatprep.subr.bf16.mxu0 %v286_v20  ;;  %v285_v21 = vsel %vm284_vm2, %v267_v19, %v269_v15 }
  0x8f   : > { %354 = vrot.lane.b32.xlu1 %v1076_v11, %s911_s21  ;;  %561 = vmatpush1.bf16.msra.mxu0 %v285_v21 }
  0x90   : > { %v305_v22 = vpop.permute.xlu0 %304 }
  0x91   : > { %v1104_v23 = vpop.permute.xlu1 %306 }
  0x92   : > { %388 = vrot.lane.b32.xlu0 %v1071_v10, %s912_s22  ;;  %v322_v24 = vsel %vm320_vm3, %v305_v22, %v1104_v23 }
  0x93   : > { %390 = vrot.lane.b32.xlu1 %v1076_v11, %s912_s22  ;;  %562 = vmatprep.subr.bf16.mxu0 %v322_v24 }
  0x94   : > { %v303_v26 = vpop.permute.xlu0 %302 }
  0x95   : > { %v341_v27 = vpop.permute.xlu1 %340  ;;  %v321_v28 = vsel %vm320_vm3, %v303_v26, %v305_v22 }
  0x96   : > { %432 = vrot.lane.b32.xlu0 %v1071_v10, %s913_s23  ;;  %563 = vmatpush1.bf16.msra.mxu0 %v321_v28 }
  0x97   : > { %434 = vrot.lane.b32.xlu1 %v897_v25, %s913_s23 }
  0x98   : > { %v1118_v30 = vpop.permute.xlu0 %342 }
  0x99   : > { %v339_v31 = vpop.permute.xlu1 %338  ;;  %v358_v32 = vsel %vm356_vm4, %v341_v27, %v1118_v30 }
  0x9a   : > { %436 = vrot.lane.b32.xlu0 %v899_v29, %s913_s23  ;;  %564 = vmatprep.subr.bf16.mxu0 %v358_v32  ;;  %v357_v33 = vsel %vm356_vm4, %v339_v31, %v341_v27 }
  0x9b   : > { %471 = vrot.lane.b32.xlu1 %v1071_v10, %s914_s26  ;;  %565 = vmatpush1.bf16.msra.mxu0 %v357_v33 }
  0x9c   : > { %v377_v34 = vpop.permute.xlu0 %376 }
  0x9d   : > { %v1126_v35 = vpop.permute.xlu1 %378 }
  0x9e   : > { %473 = vrot.lane.b32.xlu0 %v897_v25, %s914_s26  ;;  %v394_v36 = vsel %vm392_vm5, %v377_v34, %v1126_v35 }
  0x9f   : > { %475 = vrot.lane.b32.xlu1 %v899_v29, %s914_s26  ;;  %566 = vmatprep.subr.bf16.mxu0 %v394_v36 }
  0xa0   : > { %v375_v37 = vpop.permute.xlu0 %374 }
  0xa1   : > { %v421_v38 = vpop.permute.xlu1 %420  ;;  %v393_v39 = vsel %vm392_vm5, %v375_v37, %v377_v34 }
  0xa2   : > { %510 = vrot.lane.b32.xlu0 %v1071_v10, %s915_s27  ;;  %567 = vmatpush1.bf16.msra.mxu0 %v393_v39 }
  0xa3   : > { %512 = vrot.lane.b32.xlu1 %v897_v25, %s915_s27 }
  0xa4   : > { %v1136_v40 = vpop.permute.xlu0 %422 }
  0xa5   : > { %v419_v42 = vpop.permute.xlu1 %418  ;;  %v440_v43 = vsel %vm438_vm6, %v421_v38, %v1136_v40 }
  0xa6   : > { %514 = vrot.lane.b32.xlu0 %v899_v29, %s915_s27  ;;  %568 = vmatprep.subr.bf16.mxu0 %v440_v43  ;;  %v439_v44 = vsel %vm438_vm6, %v419_v42, %v421_v38 }
  0xa7   : > { %569 = vmatpush1.bf16.msra.mxu0 %v439_v44  ;;  %539 = vperm.xlu1 %882, %v536_v41  }
  0xa8   : > { %v460_v45 = vpop.permute.xlu0 %459 }
  0xa9   : > { %v1145_v46 = vpop.permute.xlu1 %461 }
  0xaa   : > { %v479_v47 = vsel %vm477_vm7, %v460_v45, %v1145_v46 }
  0xab   : > { %570 = vmatprep.subr.bf16.mxu0 %v479_v47 }
  0xac   : > { %v458_v48 = vpop.permute.xlu0 %457 }
  0xad   : > { %v499_v49 = vpop.permute.xlu1 %498  ;;  %v478_v50 = vsel %vm477_vm7, %v458_v48, %v460_v45 }
  0xae   : > { %571 = vmatpush1.bf16.msra.mxu0 %v478_v50 }
  0xb0   : > { %v1150_v51 = vpop.permute.xlu0 %500 }
  0xb1   : > { %v497_v52 = vpop.permute.xlu1 %496  ;;  %v518_v53 = vsel %vm516_vm8, %v499_v49, %v1150_v51 }
  0xb2   : > { %572 = vmatprep.subr.bf16.mxu0 %v518_v53  ;;  %v517_v54 = vsel %vm516_vm8, %v497_v52, %v499_v49 }
  0xb3   : > { %573 = vmatpush1.bf16.msra.mxu0 %v517_v54 }
  0xb4   : > { %v237_v55 = vpop.permute.xlu0 %236  ;;  %638 = vmatprep.subr.bf16.mxu0 %v1003_v7 }
  0xb5   : > { %v239_v56 = vpop.permute.xlu1 %238  ;;  %v251_v57 = vsel %vm248_vm1, %v1086_v14, %v237_v55 }
  0xb6   : > { %v252_v58 = vsel %vm248_vm1, %v237_v55, %v239_v56  ;;  %589 = vmatmul.mubr.bf16.vlgmr.msra.gmra.mrb[0].mxu0 %v981_v4 }
  0xb7   : > { %599 = vmatprep.subr.bf16.mxu1 %v252_v58  ;;  %639 = vmatpush1.bf16.msra.mxu0 %v998_v6 }
  0xb8   : > { %600 = vmatpush1.bf16.msra.mxu1 %v251_v57  ;;  %v241_v59 = vpop.permute.xlu0 %240  ;;  %858 = vmatprep.mubr.msk.bf16.mxu0 %vm552_vm0, %v985_v5 }
  0xb9   : > { %v253_v60 = vsel %vm248_vm1, %v239_v56, %v241_v59  ;;  %v1164_v61 = vpop.permute.xlu1 %242 }
  0xba   : > { %v254_v62 = vsel %vm248_vm1, %v241_v59, %v1164_v61 }
  0xbb   : > { %640 = vmatprep.subr.bf16.mxu0 %v254_v62 }
  0xbc   : > { %641 = vmatpush1.bf16.msra.mxu0 %v253_v60  ;;  %v273_v63 = vpop.permute.xlu0 %272 }
  0xbd   : > { %v275_v0 = vpop.permute.xlu1 %274  ;;  %v287_v1 = vsel %vm284_vm2, %v1095_v18, %v273_v63 }
  0xbe   : > { %v288_v2 = vsel %vm284_vm2, %v273_v63, %v275_v0 }
  0xbf   : > { %601 = vmatprep.subr.bf16.mxu1 %v288_v2 }
  0xc0   : > { %602 = vmatpush1.bf16.msra.mxu1 %v287_v1  ;;  %v277_v3 = vpop.permute.xlu0 %276 }
  0xc1   : > { %v289_v6 = vsel %vm284_vm2, %v275_v0, %v277_v3  ;;  %v1172_v7 = vpop.permute.xlu1 %278 }
  0xc2   : > { %v290_v12 = vsel %vm284_vm2, %v277_v3, %v1172_v7 }
  0xc3   : > { %642 = vmatprep.subr.bf16.mxu0 %v290_v12 }
  0xc4   : > { %643 = vmatpush1.bf16.msra.mxu0 %v289_v6  ;;  %v309_v13 = vpop.permute.xlu0 %308 }
  0xc5   : > { %v311_v14 = vpop.permute.xlu1 %310  ;;  %v323_v15 = vsel %vm320_vm3, %v1104_v23, %v309_v13 }
  0xc6   : > { %v324_v16 = vsel %vm320_vm3, %v309_v13, %v311_v14 }
  0xc7   : > { %603 = vmatprep.subr.bf16.mxu1 %v324_v16 }
  0xc8   : > { %604 = vmatpush1.bf16.msra.mxu1 %v323_v15  ;;  %v313_v17 = vpop.permute.xlu0 %312 }
  0xc9   : > { %v325_v18 = vsel %vm320_vm3, %v311_v14, %v313_v17  ;;  %v1180_v19 = vpop.permute.xlu1 %314 }
  0xca   : > { %v326_v20 = vsel %vm320_vm3, %v313_v17, %v1180_v19 }
  0xcb   : > { %644 = vmatprep.subr.bf16.mxu0 %v326_v20 }
  0xcc   : > { %645 = vmatpush1.bf16.msra.mxu0 %v325_v18  ;;  %v345_v21 = vpop.permute.xlu0 %344 }
  0xcd   : > { %v347_v22 = vpop.permute.xlu1 %346  ;;  %v359_v24 = vsel %vm356_vm4, %v1118_v30, %v345_v21 }
  0xce   : > { %v360_v23 = vsel %vm356_vm4, %v345_v21, %v347_v22 }
  0xcf   : > { %605 = vmatprep.subr.bf16.mxu1 %v360_v23 }
  0xd0   : > { %606 = vmatpush1.bf16.msra.mxu1 %v359_v24  ;;  %v349_v25 = vpop.permute.xlu0 %348 }
  0xd1   : > { %v361_v26 = vsel %vm356_vm4, %v347_v22, %v349_v25  ;;  %v1188_v27 = vpop.permute.xlu1 %350 }
  0xd2   : > { %v362_v28 = vsel %vm356_vm4, %v349_v25, %v1188_v27 }
  0xd3   : > { %646 = vmatprep.subr.bf16.mxu0 %v362_v28 }
  0xd4   : > { %647 = vmatpush1.bf16.msra.mxu0 %v361_v26  ;;  %v381_v29 = vpop.permute.xlu0 %380 }
  0xd5   : > { %v383_v31 = vpop.permute.xlu1 %382  ;;  %v395_v32 = vsel %vm392_vm5, %v1126_v35, %v381_v29 }
  0xd6   : > { %v396_v30 = vsel %vm392_vm5, %v381_v29, %v383_v31 }
  0xd7   : > { %607 = vmatprep.subr.bf16.mxu1 %v396_v30 }
  0xd8   : > { %608 = vmatpush1.bf16.msra.mxu1 %v395_v32  ;;  %v385_v33 = vpop.permute.xlu0 %384 }
  0xd9   : > { %v397_v34 = vsel %vm392_vm5, %v383_v31, %v385_v33  ;;  %v1196_v36 = vpop.permute.xlu1 %386 }
  0xda   : > { %v398_v37 = vsel %vm392_vm5, %v385_v33, %v1196_v36 }
  0xdb   : > { %648 = vmatprep.subr.bf16.mxu0 %v398_v37 }
  0xdc   : > { %649 = vmatpush1.bf16.msra.mxu0 %v397_v34  ;;  %v425_v38 = vpop.permute.xlu0 %424 }
  0xdd   : > { %v427_v39 = vpop.permute.xlu1 %426  ;;  %v441_v41 = vsel %vm438_vm6, %v1136_v40, %v425_v38 }
  0xde   : > { %v442_v35 = vsel %vm438_vm6, %v425_v38, %v427_v39 }
  0xdf   : > { %609 = vmatprep.subr.bf16.mxu1 %v442_v35 }
  0xe0   : > { %610 = vmatpush1.bf16.msra.mxu1 %v441_v41  ;;  %v429_v42 = vpop.permute.xlu0 %428 }
  0xe1   : > { %v443_v43 = vsel %vm438_vm6, %v427_v39, %v429_v42  ;;  %v1204_v44 = vpop.permute.xlu1 %430 }
  0xe2   : > { %v444_v45 = vsel %vm438_vm6, %v429_v42, %v1204_v44 }
  0xe3   : > { %650 = vmatprep.subr.bf16.mxu0 %v444_v45 }
  0xe4   : > { %651 = vmatpush1.bf16.msra.mxu0 %v443_v43  ;;  %v464_v47 = vpop.permute.xlu0 %463 }
  0xe5   : > { %v466_v48 = vpop.permute.xlu1 %465  ;;  %v480_v49 = vsel %vm477_vm7, %v1145_v46, %v464_v47 }
  0xe6   : > { %v481_v40 = vsel %vm477_vm7, %v464_v47, %v466_v48 }
  0xe7   : > { %611 = vmatprep.subr.bf16.mxu1 %v481_v40 }
  0xe8   : > { %612 = vmatpush1.bf16.msra.mxu1 %v480_v49  ;;  %v468_v50 = vpop.permute.xlu0 %467 }
  0xe9   : > { %v482_v52 = vsel %vm477_vm7, %v466_v48, %v468_v50  ;;  %v1212_v53 = vpop.permute.xlu1 %469 }
  0xea   : > { %v483_v54 = vsel %vm477_vm7, %v468_v50, %v1212_v53 }
  0xeb   : > { %652 = vmatprep.subr.bf16.mxu0 %v483_v54 }
  0xec   : > { %653 = vmatpush1.bf16.msra.mxu0 %v482_v52  ;;  %v503_v55 = vpop.permute.xlu0 %502 }
  0xed   : > { %v505_v56 = vpop.permute.xlu1 %504  ;;  %v519_v57 = vsel %vm516_vm8, %v1150_v51, %v503_v55 }
  0xee   : > { %v520_v46 = vsel %vm516_vm8, %v503_v55, %v505_v56 }
  0xef   : > { %613 = vmatprep.subr.bf16.mxu1 %v520_v46 }
  0xf0   : > { %614 = vmatpush1.bf16.msra.mxu1 %v519_v57  ;;  %v507_v58 = vpop.permute.xlu0 %506 }
  0xf1   : > { %v521_v59 = vsel %vm516_vm8, %v505_v56, %v507_v58  ;;  %v1220_v60 = vpop.permute.xlu1 %508  ;;  %679 = vmatprep.subr.bf16.mxu1 %v1071_v10 }
  0xf2   : > { %v522_v62 = vsel %vm516_vm8, %v507_v58, %v1220_v60 }
  0xf3   : > { %654 = vmatprep.subr.bf16.mxu0 %v522_v62  ;;  %630 = vmatmul.mubr.bf16.vlgmr.msra.gmra.mrb[0].mxu1 %v981_v4 }
  0xf4   : > { %655 = vmatpush1.bf16.msra.mxu0 %v521_v59  ;;  %680 = vmatpush1.bf16.msra.mxu1 %v1008_v8  ;;  %v245_v51 = vpop.permute.xlu0 %244 }
  0xf5   : > { %v255_v63 = vsel %vm248_vm1, %v1164_v61, %v245_v51  ;;  %v247_v0 = vpop.permute.xlu1 %246  ;;  %720 = vmatprep.subr.bf16.mxu0 %v916_v9  ;;  %859 = vmatprep.mubr.msk.bf16.mxu1 %vm552_vm0, %v985_v5 }
  0xf6   : > { %v256_v10 = vsel %vm248_vm1, %v245_v51, %v247_v0 }
  0xf7   : > { %681 = vmatprep.subr.bf16.mxu1 %v256_v10  ;;  %671 = vmatmul.mubr.bf16.vlgmr.msra.gmra.mrb[4].mxu0 %v981_v4 }
  0xf8   : > { %682 = vmatpush1.bf16.msra.mxu1 %v255_v63  ;;  %721 = vmatpush1.bf16.msra.mxu0 %v1076_v11  ;;  %v281_v1 = vpop.permute.xlu0 %280 }
  0xf9   : > { %v291_v8 = vsel %vm284_vm2, %v1172_v7, %v281_v1  ;;  %v283_v2 = vpop.permute.xlu1 %282  ;;  %722 = vmatprep.subr.bf16.mxu0 %v916_v9  ;;  %860 = vmatprep.mubr.msk.bf16.mxu0 %vm552_vm0, %v985_v5 }
  0xfa   : > { %v292_v61 = vsel %vm284_vm2, %v281_v1, %v283_v2 }
  0xfb   : > { %683 = vmatprep.subr.bf16.mxu1 %v292_v61 }
  0xfc   : > { %684 = vmatpush1.bf16.msra.mxu1 %v291_v8  ;;  %723 = vmatpush1.bf16.msra.mxu0 %v247_v0  ;;  %v317_v3 = vpop.permute.xlu0 %316 }
  0xfd   : > { %v327_v6 = vsel %vm320_vm3, %v1180_v19, %v317_v3  ;;  %v319_v11 = vpop.permute.xlu1 %318  ;;  %724 = vmatprep.subr.bf16.mxu0 %v916_v9 }
  0xfe   : > { %v328_v7 = vsel %vm320_vm3, %v317_v3, %v319_v11 }
  0xff   : > { %685 = vmatprep.subr.bf16.mxu1 %v328_v7 }
 0x100   : > { %686 = vmatpush1.bf16.msra.mxu1 %v327_v6  ;;  %725 = vmatpush1.bf16.msra.mxu0 %v283_v2  ;;  %v353_v12 = vpop.permute.xlu0 %352 }
 0x101   : > { %v363_v5 = vsel %vm356_vm4, %v1188_v27, %v353_v12  ;;  %v355_v13 = vpop.permute.xlu1 %354  ;;  %726 = vmatprep.subr.bf16.mxu0 %v916_v9 }
 0x102   : > { %v364_v14 = vsel %vm356_vm4, %v353_v12, %v355_v13 }
 0x103   : > { %687 = vmatprep.subr.bf16.mxu1 %v364_v14 }
 0x104   : > { %688 = vmatpush1.bf16.msra.mxu1 %v363_v5  ;;  %727 = vmatpush1.bf16.msra.mxu0 %v319_v11  ;;  %v389_v15 = vpop.permute.xlu0 %388 }
 0x105   : > { %v399_v16 = vsel %vm392_vm5, %v1196_v36, %v389_v15  ;;  %v391_v17 = vpop.permute.xlu1 %390  ;;  %728 = vmatprep.subr.bf16.mxu0 %v916_v9 }
 0x106   : > { %v400_v18 = vsel %vm392_vm5, %v389_v15, %v391_v17 }
 0x107   : > { %689 = vmatprep.subr.bf16.mxu1 %v400_v18 }
 0x108   : > { %690 = vmatpush1.bf16.msra.mxu1 %v399_v16  ;;  %729 = vmatpush1.bf16.msra.mxu0 %v355_v13  ;;  %v433_v19 = vpop.permute.xlu0 %432 }
 0x109   : > { %v445_v20 = vsel %vm438_vm6, %v1204_v44, %v433_v19  ;;  %v435_v21 = vpop.permute.xlu1 %434  ;;  %730 = vmatprep.subr.bf16.mxu0 %v916_v9 }
 0x10a   : > { %v446_v22 = vsel %vm438_vm6, %v433_v19, %v435_v21 }
 0x10b   : > { %691 = vmatprep.subr.bf16.mxu1 %v446_v22 }
 0x10c   : > { %692 = vmatpush1.bf16.msra.mxu1 %v445_v20  ;;  %731 = vmatpush1.bf16.msra.mxu0 %v391_v17  ;;  %v437_v24 = vpop.permute.xlu0 %436 }
 0x10d   : > { %v447_v23 = vsel %vm438_vm6, %v435_v21, %v437_v24  ;;  %v472_v25 = vpop.permute.xlu1 %471  ;;  %732 = vmatprep.subr.bf16.mxu0 %v916_v9 }
 0x10e   : > { %v484_v29 = vsel %vm477_vm7, %v1212_v53, %v472_v25 }
 0x110   : > { %733 = vmatpush1.bf16.msra.mxu0 %v447_v23  ;;  %v474_v26 = vpop.permute.xlu0 %473 }
 0x111   : > { %v476_v27 = vpop.permute.xlu1 %475  ;;  %v485_v28 = vsel %vm477_vm7, %v472_v25, %v474_v26  ;;  %734 = vmatprep.subr.bf16.mxu0 %v916_v9 }
 0x112   : > { %v486_v31 = vsel %vm477_vm7, %v474_v26, %v476_v27  ;;  %693 = vmatprep.subr.bf16.mxu1 %v485_v28 }
 0x113   : > { %694 = vmatpush1.bf16.msra.mxu1 %v484_v29 }
 0x114   : > { %735 = vmatpush1.bf16.msra.mxu0 %v486_v31  ;;  %v511_v32 = vpop.permute.xlu0 %510 }
 0x115   : > { %v523_v30 = vsel %vm516_vm8, %v1220_v60, %v511_v32  ;;  %v513_v33 = vpop.permute.xlu1 %512  ;;  %736 = vmatprep.subr.bf16.mxu0 %v916_v9 }
 0x116   : > { %v524_v34 = vsel %vm516_vm8, %v511_v32, %v513_v33 }
 0x117   : > { %695 = vmatprep.subr.bf16.mxu1 %v524_v34 }
 0x118   : > { %696 = vmatpush1.bf16.msra.mxu1 %v523_v30  ;;  %v515_v36 = vpop.permute.xlu0 %514 }
 0x119   : > { %v525_v37 = vsel %vm516_vm8, %v513_v33, %v515_v36 }
 0x11a   : > { %737 = vmatpush1.bf16.msra.mxu0 %v525_v37 }
 0x11b   : > { %712 = vmatmul.mubr.bf16.vlgmr.msra.gmra.mrb[4].mxu1 %v981_v4 }
 0x11d   : > { %753 = vmatmul.mubr.bf16.vlgmr.msra.gmra.mrb[8].mxu0 %v981_v4 }
 0x126   : > { %v540_v38 = vpop.permute.xlu1 %539 }
 0x189   : > { %v590_v39 = vpop.f32.mrb[0].mxu0 }
 0x18a   : > { %v592_v41 = vpop.f32.mrb[1].mxu0  ;;  %v591_v35 = vadd.f32 %v590_v39, %v540_v38 }
 0x18b   : > { %v594_v42 = vpop.f32.mrb[2].mxu0  ;;  %v593_v43 = vadd.f32 %v592_v41, %v540_v38 }
 0x18c   : > { %v595_v9 = vpop.f32.mrb[3].mxu0 }
 0x18d   : > { %v768_v44 = vcombine.low %v591_v35, %v593_v43 }
 0x18f   : > { %776 = vst [vmem:[%s1275_s6] sm:$0xff] %v768_v44 }
 0x1c6   : > { %v631_v45 = vpop.f32.mrb[0].mxu1 }
 0x1c7   : > { %v632_v4 = vadd.f32 %v631_v45, %v540_v38  ;;  %v633_v47 = vpop.f32.mrb[1].mxu1 }
 0x1c8   : > { %v634_v48 = vadd.f32 %v633_v47, %v540_v38  ;;  %v635_v49 = vpop.f32.mrb[2].mxu1 }
 0x1c9   : > { %v636_v40 = vpop.f32.mrb[3].mxu1 }
 0x1ca   : > { %v769_v50 = vcombine.low %v632_v4, %v634_v48  ;;  %v672_v52 = vpop.f32.mrb[4].mxu0 }
 0x1cb   : > { %v673_v53 = vadd.f32 %v672_v52, %v540_v38  ;;  %v674_v54 = vpop.f32.mrb[5].mxu0 }
 0x1cc   : > { %777 = vst [vmem:[%s1275_s6 + $0x8] sm:$0xff] %v769_v50  ;;  %v675_v55 = vadd.f32 %v674_v54, %v540_v38  ;;  %v676_v56 = vpop.f32.mrb[6].mxu0 }
 0x1cd   : > { %v677_v57 = vpop.f32.mrb[7].mxu0 }
 0x1ce   : > { %v770_v46 = vcombine.low %v673_v53, %v675_v55 }
 0x1d0   : > { %778 = vst [vmem:[%s1275_s6 + $0x10] sm:$0xff] %v770_v46 }
 0x1ee   : > { %v713_v58 = vpop.f32.mrb[4].mxu1 }
 0x1ef   : > { %v714_v59 = vadd.f32 %v713_v58, %v540_v38  ;;  %v715_v60 = vpop.f32.mrb[5].mxu1 }
 0x1f0   : > { %v716_v62 = vadd.f32 %v715_v60, %v540_v38  ;;  %v717_v51 = vpop.f32.mrb[6].mxu1  ;;  %v754_v63 = vpop.f32.mrb[8].mxu0 }
 0x1f1   : > { %v718_v0 = vpop.f32.mrb[7].mxu1  ;;  %v755_v10 = vadd.f32 %v754_v63, %v540_v38  ;;  %v756_v1 = vpop.f32.mrb[9].mxu0 }
 0x1f2   : > { %v771_v8 = vcombine.low %v714_v59, %v716_v62  ;;  %v757_v2 = vpop.f32.mrb[10].mxu0 }
 0x1f3   : > { %781 = vst.msk [vmem:[%s1275_s6 + $0x20] sm:$0xf] %vm780_vm9, %v755_v10  ;;  %v758_v61 = vpop.f32.mrb[11].mxu0 }
 0x1f4   : > { %779 = vst [vmem:[%s1275_s6 + $0x18] sm:$0xff] %v771_v8 }
 0x1f5 PF: > { %s13_s12 = sadd.s32 1, %s906_s12  }
 0x1f6   : > { %p10_p4 = scmp.ge.s32.totalorder %s13_s12, 4  }
 0x1f8   :  { %12 = sbr.rel (!%p10_p4) target bundleno = 1 (0x1), region = 62 }

</bundles_post_ra>
